<compile_context>
chip_gen: v7x
topology: tpu7x:2x2x1
jax: 0.10.0
libtpu: 0.0.40
codegen_flags: <defaults>
</compile_context>

<pallas_src>
import jax
import jax.numpy as jnp
from jax.experimental import pallas as pl
from jax.experimental.pallas import tpu as pltpu

EPS = 1e-5
_VMEM_ROW_BUDGET = 6 * 1024 * 1024  # per-call double-buffered working-set budget


def _pick_rows(m, bytes_per_row):
    """Largest divisor of m that fits the VMEM budget (<= 2048 rows), preferring
    sublane-aligned (multiple-of-8) blocks; falls back to the full extent."""
    cap = max(8, min(2048, _VMEM_ROW_BUDGET // max(1, 2 * bytes_per_row)))
    cap = min(m, cap)
    for t in range(cap, 0, -1):
        if m % t == 0 and (t % 8 == 0 or t == m):
            return t
    return m


# ----------------------------- kernels --------------------------------------

def _conv1_stats_kernel(x_ref, w_ref, b_ref, y_ref, sum_ref, ssq_ref):
    """1x1 conv on the LOW-RES input (hoisted before the upsample) +
    per-channel sum / sum-of-squares accumulation for BN1."""
    y = (jnp.dot(x_ref[...], w_ref[...], preferred_element_type=jnp.float32)
         + b_ref[...])
    y_ref[...] = y

    @pl.when(pl.program_id(0) == 0)
    def _():
        sum_ref[...] = jnp.zeros_like(sum_ref)
        ssq_ref[...] = jnp.zeros_like(ssq_ref)

    # TODO(synk): E[y^2]-E[y]^2 accumulation can cancel for very large M /
    # large means; switch to shifted sums if production shapes grow.
    sum_ref[...] += jnp.sum(y, axis=0, keepdims=True)
    ssq_ref[...] += jnp.sum(y * y, axis=0, keepdims=True)


def _fuse_kernel(y1_ref, hi_ref, sc_ref, sh_ref, w2a_ref, w2b_ref, b2_ref,
                 y2_ref, sum_ref, ssq_ref):
    """BN1 affine + relu on the low-res conv1 output, implicit nearest 2x
    upsample (the shared `u @ w2a` term is reused for all 4 high-res pixels),
    concat([up, hi]) 1x1 conv as a split matmul, BN2 stat accumulation.

    Output block is lane-dense (tm, 4*nf): the four sub-pixel results are
    concatenated along the lane axis in registers and stored with one wide
    store instead of four narrow ones."""
    u = jnp.maximum(y1_ref[...] * sc_ref[...] + sh_ref[...], 0.0)
    t = jnp.dot(u, w2a_ref[...], preferred_element_type=jnp.float32) + b2_ref[...]

    @pl.when(pl.program_id(0) == 0)
    def _():
        sum_ref[...] = jnp.zeros_like(sum_ref)
        ssq_ref[...] = jnp.zeros_like(ssq_ref)

    # static unroll over the 2x2 nearest-neighbour footprint (k = 2*dh + dw)
    ys = [t + jnp.dot(hi_ref[k], w2b_ref[...], preferred_element_type=jnp.float32)
          for k in range(4)]
    y2_ref[...] = jnp.concatenate(ys, axis=-1)
    # VPU sums first, then a single cross-row (XLU) reduction per statistic.
    sum_ref[...] += jnp.sum((ys[0] + ys[1]) + (ys[2] + ys[3]),
                            axis=0, keepdims=True)
    ssq_ref[...] += jnp.sum((ys[0] * ys[0] + ys[1] * ys[1]) +
                            (ys[2] * ys[2] + ys[3] * ys[3]),
                            axis=0, keepdims=True)


def _bn_apply_kernel(y_ref, sc_ref, sh_ref, o_ref):
    """Final BatchNorm affine (scale/shift folded from batch stats)."""
    o_ref[...] = y_ref[...] * sc_ref[...] + sh_ref[...]


# --------------------------- pallas_call wrappers ----------------------------

def _conv1_with_stats(x, w, b):
    M, cin = x.shape
    cout = w.shape[1]
    tm = _pick_rows(M, 4 * (cin + cout))
    grid = (M // tm,)
    return pl.pallas_call(
        _conv1_stats_kernel,
        out_shape=(jax.ShapeDtypeStruct((M, cout), jnp.float32),
                   jax.ShapeDtypeStruct((1, cout), jnp.float32),
                   jax.ShapeDtypeStruct((1, cout), jnp.float32)),
        grid_spec=pltpu.PrefetchScalarGridSpec(
            num_scalar_prefetch=0, grid=grid,
            in_specs=[pl.BlockSpec((tm, cin), lambda i: (i, 0)),
                      pl.BlockSpec((cin, cout), lambda i: (0, 0)),
                      pl.BlockSpec((1, cout), lambda i: (0, 0))],
            out_specs=[pl.BlockSpec((tm, cout), lambda i: (i, 0)),
                       pl.BlockSpec((1, cout), lambda i: (0, 0)),
                       pl.BlockSpec((1, cout), lambda i: (0, 0))]),
        compiler_params=pltpu.CompilerParams(dimension_semantics=("arbitrary",)),
    )(x, w, b.reshape(1, cout))


def _bn_relu_upconcat_conv(y1, hi4, sc1, sh1, w2a, w2b, b2):
    M, nf = y1.shape               # M = B*H*W (low-res rows)
    tm = _pick_rows(M, 4 * (nf + 4 * nf + 4 * nf))
    grid = (M // tm,)
    return pl.pallas_call(
        _fuse_kernel,
        out_shape=(jax.ShapeDtypeStruct((M, 4 * nf), jnp.float32),
                   jax.ShapeDtypeStruct((1, nf), jnp.float32),
                   jax.ShapeDtypeStruct((1, nf), jnp.float32)),
        grid_spec=pltpu.PrefetchScalarGridSpec(
            num_scalar_prefetch=0, grid=grid,
            in_specs=[pl.BlockSpec((tm, nf), lambda i: (i, 0)),
                      pl.BlockSpec((4, tm, nf), lambda i: (0, i, 0)),
                      pl.BlockSpec((1, nf), lambda i: (0, 0)),
                      pl.BlockSpec((1, nf), lambda i: (0, 0)),
                      pl.BlockSpec((nf, nf), lambda i: (0, 0)),
                      pl.BlockSpec((nf, nf), lambda i: (0, 0)),
                      pl.BlockSpec((1, nf), lambda i: (0, 0))],
            out_specs=[pl.BlockSpec((tm, 4 * nf), lambda i: (i, 0)),
                       pl.BlockSpec((1, nf), lambda i: (0, 0)),
                       pl.BlockSpec((1, nf), lambda i: (0, 0))]),
        compiler_params=pltpu.CompilerParams(dimension_semantics=("arbitrary",)),
    )(y1, hi4, sc1, sh1, w2a, w2b, b2.reshape(1, nf))


def _bn2_apply(y2, sc2, sh2):
    M, c4 = y2.shape               # c4 = 4*nf, channels fastest with period nf
    nf = sc2.shape[-1]
    total = M * c4
    if total % 128 == 0 and nf <= 128 and 128 % nf == 0:
        # Lane-dense path: pure reinterpretation of the flat buffer as
        # (rows, 128); with channels fastest and nf | 128, the per-lane channel
        # pattern is identical in every row, so scale/shift are tiled to 128.
        rows = total // 128
        yf = y2.reshape(rows, 128)
        reps = 128 // nf
        sc = jnp.tile(sc2.reshape(-1), reps).reshape(1, 128)
        sh = jnp.tile(sh2.reshape(-1), reps).reshape(1, 128)
        tr = _pick_rows(rows, 4 * 2 * 128)
        out = pl.pallas_call(
            _bn_apply_kernel,
            out_shape=jax.ShapeDtypeStruct((rows, 128), jnp.float32),
            grid_spec=pltpu.PrefetchScalarGridSpec(
                num_scalar_prefetch=0, grid=(rows // tr,),
                in_specs=[pl.BlockSpec((tr, 128), lambda i: (i, 0)),
                          pl.BlockSpec((1, 128), lambda i: (0, 0)),
                          pl.BlockSpec((1, 128), lambda i: (0, 0))],
                out_specs=pl.BlockSpec((tr, 128), lambda i: (i, 0))),
            compiler_params=pltpu.CompilerParams(dimension_semantics=("parallel",)),
        )(yf, sc, sh)
        return out.reshape(M, c4)

    # Fallback (nf does not divide 128): plain channels-last elementwise pass.
    yf = y2.reshape(M * 4, nf)
    tm = _pick_rows(M * 4, 4 * 2 * nf)
    out = pl.pallas_call(
        _bn_apply_kernel,
        out_shape=jax.ShapeDtypeStruct((M * 4, nf), jnp.float32),
        grid_spec=pltpu.PrefetchScalarGridSpec(
            num_scalar_prefetch=0, grid=((M * 4) // tm,),
            in_specs=[pl.BlockSpec((tm, nf), lambda i: (i, 0)),
                      pl.BlockSpec((1, nf), lambda i: (0, 0)),
                      pl.BlockSpec((1, nf), lambda i: (0, 0))],
            out_specs=pl.BlockSpec((tm, nf), lambda i: (i, 0))),
        compiler_params=pltpu.CompilerParams(dimension_semantics=("parallel",)),
    )(yf, sc2.reshape(1, nf), sh2.reshape(1, nf))
    return out.reshape(M, c4)


# --------------------------- module forward ----------------------------------

def _bn_affine_from_stats(s, ss, n, gamma, beta, eps=EPS):
    """Fold training-mode BatchNorm (biased batch variance) into scale/shift."""
    mean = s / n
    var = ss / n - mean * mean
    scale = gamma.reshape(1, -1) / jnp.sqrt(var + eps)
    shift = beta.reshape(1, -1) - mean * scale
    return scale, shift


def combine_layers_forward(lo_nchw, hi_nchw, p):
    B, C2, H, W = lo_nchw.shape
    nf = C2 // 2
    Ho, Wo = 2 * H, 2 * W
    M_lo = B * H * W
    M_hi = B * Ho * Wo

    # lo: NCHW -> channels-last rows (single XLA pass over the small low-res tensor)
    x1 = (jnp.transpose(lo_nchw, (0, 2, 3, 1))
          .astype(jnp.float32).reshape(M_lo, 2 * nf))

    # hi: NCHW -> (dh*2+dw, B*H*W, nf): groups the four high-res pixels that
    # share one low-res source pixel, so kernel 2 performs the nearest 2x
    # upsample implicitly (single XLA pass, replaces the plain NHWC transpose).
    hi4 = (hi_nchw.astype(jnp.float32)
           .reshape(B, nf, H, 2, W, 2)
           .transpose(3, 5, 0, 2, 4, 1)          # (dh, dw, B, H, W, nf)
           .reshape(4, M_lo, nf))

    # --- UpSample2D's Conv2DNormed: 1x1 conv hoisted before the upsample ---
    y1, s1, ss1 = _conv1_with_stats(x1, p["w1"], p["b1"])
    # every low-res pixel appears 4x in the reference's BN1 batch stats
    sc1, sh1 = _bn_affine_from_stats(4.0 * s1, 4.0 * ss1, float(M_hi),
                                     p["g1"], p["be1"])

    # --- relu + implicit 2x upsample + concat([up, hi]) 1x1 conv + BN2 stats ---
    w2a, w2b = p["w2"][:nf], p["w2"][nf:]        # concat order is [up, hi]
    y2, s2, ss2 = _bn_relu_upconcat_conv(y1, hi4, sc1, sh1, w2a, w2b, p["b2"])
    sc2, sh2 = _bn_affine_from_stats(s2, ss2, float(M_hi), p["g2"], p["be2"])

    # --- final BatchNorm affine (lane-dense elementwise pass) ---
    out = _bn2_apply(y2, sc2, sh2)               # (M_lo, 4*nf), channel fastest

    # back to NCHW (single XLA pass over the output tensor);
    # per-pixel layout is (dh, dw, c) with k = 2*dh + dw matching hi4.
    out = (out.reshape(B, H, W, 2, 2, nf)
              .transpose(0, 5, 1, 3, 2, 4)       # (B, nf, H, dh, W, dw)
              .reshape(B, nf, Ho, Wo))
    return out


# --------------------------- pure-JAX reference -------------------------------

def _ref_bn_train(x, gamma, beta, eps=EPS):
    mean = jnp.mean(x, axis=(0, 1, 2), keepdims=True)
    var = jnp.mean((x - mean) ** 2, axis=(0, 1, 2), keepdims=True)  # biased
    return (x - mean) / jnp.sqrt(var + eps) * gamma + beta


def reference_forward(lo_nchw, hi_nchw, p):
    lo = jnp.transpose(lo_nchw, (0, 2, 3, 1))
    hi = jnp.transpose(hi_nchw, (0, 2, 3, 1))
    up = jnp.repeat(jnp.repeat(lo, 2, axis=1), 2, axis=2)
    y1 = jnp.einsum("bhwc,cd->bhwd", up, p["w1"]) + p["b1"]
    y1 = _ref_bn_train(y1, p["g1"], p["be1"])
    u = jax.nn.relu(y1)
    x = jnp.concatenate([u, hi], axis=-1)
    y2 = jnp.einsum("bhwc,cd->bhwd", x, p["w2"]) + p["b2"]
    y2 = _ref_bn_train(y2, p["g2"], p["be2"])
    return jnp.transpose(y2, (0, 3, 1, 2))


# ----------------------------------- main -------------------------------------

if __name__ == "__main__":
    nf = 4              # nfilters
    B, H, W = 2, 8, 8   # _layer_lo spatial; _layer_hi is (B, nf, 2H, 2W)

    key = jax.random.PRNGKey(0)
    ks = jax.random.split(key, 12)

    # Deterministic synthetic parameters (shapes from the module's __init__):
    #  UpSample2D.conv: Conv2d(2nf -> nf, 1x1) + BatchNorm2d(nf)
    #  conv_normed:     Conv2d(2nf -> nf, 1x1) + BatchNorm2d(nf)
    params = {
        "w1": 0.2 * jax.random.normal(ks[0], (2 * nf, nf), jnp.float32),
        "b1": 0.1 * jax.random.normal(ks[1], (nf,), jnp.float32),
        "g1": 1.0 + 0.1 * jax.random.normal(ks[2], (nf,), jnp.float32),
        "be1": 0.1 * jax.random.normal(ks[3], (nf,), jnp.float32),
        "w2": 0.2 * jax.random.normal(ks[4], (2 * nf, nf), jnp.float32),
        "b2": 0.1 * jax.random.normal(ks[5], (nf,), jnp.float32),
        "g2": 1.0 + 0.1 * jax.random.normal(ks[6], (nf,), jnp.float32),
        "be2": 0.1 * jax.random.normal(ks[7], (nf,), jnp.float32),
    }

    layer_lo = jax.random.normal(ks[8], (B, 2 * nf, H, W), jnp.float32)
    layer_hi = jax.random.normal(ks[9], (B, nf, 2 * H, 2 * W), jnp.float32)

    fwd = jax.jit(combine_layers_forward)
    out = fwd(layer_lo, layer_hi, params)
    out = jax.block_until_ready(out)

    ref = reference_forward(layer_lo, layer_hi, params)
    assert out.shape == (B, nf, 2 * H, 2 * W), out.shape
    assert jnp.allclose(out, ref, rtol=1e-4, atol=1e-4), \
        float(jnp.max(jnp.abs(out - ref)))

    # TODO(synk): BatchNorm running-stat (momentum) updates are stateful side
    # effects that don't influence the forward output and are not modeled.
    print("KERNEL_OK")
</pallas_src>

<mosaic_0001>
module attributes {stable_mosaic.version = 11 : i64} {
  func.func @_conv1_stats_kernel(%arg0: i32, %arg1: memref<128x8xf32, #tpu.memory_space<vmem>>, %arg2: memref<8x4xf32, #tpu.memory_space<vmem>>, %arg3: memref<1x4xf32, #tpu.memory_space<vmem>>, %arg4: memref<128x4xf32, #tpu.memory_space<vmem>>, %arg5: memref<1x4xf32, #tpu.memory_space<vmem>>, %arg6: memref<1x4xf32, #tpu.memory_space<vmem>>) attributes {dimension_semantics = [#tpu.dimension_semantics<arbitrary>], iteration_bounds = array<i64: 1>, scalar_prefetch = 0 : i64, scratch_operands = 0 : i64, tpu.core_type = #tpu.core_type<tc>, window_params = [{transform_indices = @transform_0, window_bounds = array<i64: 128, 8>}, {pipeline_mode = #tpu.pipeline_mode<synchronous>, transform_indices = @transform_1, window_bounds = array<i64: 8, 4>}, {pipeline_mode = #tpu.pipeline_mode<synchronous>, transform_indices = @transform_2, window_bounds = array<i64: 1, 4>}, {transform_indices = @transform_3, window_bounds = array<i64: 128, 4>}, {pipeline_mode = #tpu.pipeline_mode<synchronous>, transform_indices = @transform_4, window_bounds = array<i64: 1, 4>}, {pipeline_mode = #tpu.pipeline_mode<synchronous>, transform_indices = @transform_5, window_bounds = array<i64: 1, 4>}]} {
    %c0 = arith.constant 0 : index
    %c0_0 = arith.constant 0 : index
    %0 = vector.load %arg1[%c0, %c0_0] : memref<128x8xf32, #tpu.memory_space<vmem>>, vector<128x8xf32>
    %c0_1 = arith.constant 0 : index
    %c0_2 = arith.constant 0 : index
    %1 = vector.load %arg2[%c0_1, %c0_2] : memref<8x4xf32, #tpu.memory_space<vmem>>, vector<8x4xf32>
    %cst = arith.constant dense<0.000000e+00> : vector<128x4xf32>
    %2 = tpu.matmul %0, %1, %cst {dimension_numbers = #tpu.dot_dimension_numbers<[1], [0], [0], [1], [0, 0, 1, 1], [], []>} : vector<128x8xf32>, vector<8x4xf32>, vector<128x4xf32> -> vector<128x4xf32>
    %c0_3 = arith.constant 0 : index
    %c0_4 = arith.constant 0 : index
    %3 = vector.load %arg3[%c0_3, %c0_4] : memref<1x4xf32, #tpu.memory_space<vmem>>, vector<1x4xf32>
    %4 = vector.broadcast %3 : vector<1x4xf32> to vector<128x4xf32>
    %5 = arith.addf %2, %4 : vector<128x4xf32>
    %c0_5 = arith.constant 0 : index
    %c0_6 = arith.constant 0 : index
    %6 = vector.load %arg4[%c0_5, %c0_6] : memref<128x4xf32, #tpu.memory_space<vmem>>, vector<128x4xf32>
    tpu.vector_store %arg4[%c0_5, %c0_6], %5 {strides = array<i32>} : memref<128x4xf32, #tpu.memory_space<vmem>>, vector<128x4xf32>,
    %c0_i32 = arith.constant 0 : i32
    %7 = arith.cmpi eq, %arg0, %c0_i32 : i32
    %8 = arith.extui %7 : i1 to i32
    %c0_i32_7 = arith.constant 0 : i32
    %9 = arith.cmpi ne, %8, %c0_i32_7 : i32
    scf.if %9 {
      %cst_18 = arith.constant 0.000000e+00 : f32
      %21 = vector.broadcast %cst_18 : f32 to vector<1x4xf32>
      %c0_19 = arith.constant 0 : index
      %c0_20 = arith.constant 0 : index
      %22 = vector.load %arg5[%c0_19, %c0_20] : memref<1x4xf32, #tpu.memory_space<vmem>>, vector<1x4xf32>
      tpu.vector_store %arg5[%c0_19, %c0_20], %21 {strides = array<i32>} : memref<1x4xf32, #tpu.memory_space<vmem>>, vector<1x4xf32>,
      %cst_21 = arith.constant 0.000000e+00 : f32
      %23 = vector.broadcast %cst_21 : f32 to vector<1x4xf32>
      %c0_22 = arith.constant 0 : index
      %c0_23 = arith.constant 0 : index
      %24 = vector.load %arg6[%c0_22, %c0_23] : memref<1x4xf32, #tpu.memory_space<vmem>>, vector<1x4xf32>
      tpu.vector_store %arg6[%c0_22, %c0_23], %23 {strides = array<i32>} : memref<1x4xf32, #tpu.memory_space<vmem>>, vector<1x4xf32>,
    } else {
    }
    %c0_8 = arith.constant 0 : index
    %c0_9 = arith.constant 0 : index
    %10 = vector.load %arg5[%c0_8, %c0_9] : memref<1x4xf32, #tpu.memory_space<vmem>>, vector<1x4xf32>
    %cst_10 = arith.constant dense<0.000000e+00> : vector<4xf32>
    %11 = vector.multi_reduction <add>, %5, %cst_10 [0] : vector<128x4xf32> to vector<4xf32>
    %12 = vector.shape_cast %11 : vector<4xf32> to vector<1x4xf32>
    %13 = arith.addf %10, %12 : vector<1x4xf32>
    %c0_11 = arith.constant 0 : index
    %c0_12 = arith.constant 0 : index
    %14 = vector.load %arg5[%c0_11, %c0_12] : memref<1x4xf32, #tpu.memory_space<vmem>>, vector<1x4xf32>
    tpu.vector_store %arg5[%c0_11, %c0_12], %13 {strides = array<i32>} : memref<1x4xf32, #tpu.memory_space<vmem>>, vector<1x4xf32>,
    %c0_13 = arith.constant 0 : index
    %c0_14 = arith.constant 0 : index
    %15 = vector.load %arg6[%c0_13, %c0_14] : memref<1x4xf32, #tpu.memory_space<vmem>>, vector<1x4xf32>
    %16 = arith.mulf %5, %5 : vector<128x4xf32>
    %cst_15 = arith.constant dense<0.000000e+00> : vector<4xf32>
    %17 = vector.multi_reduction <add>, %16, %cst_15 [0] : vector<128x4xf32> to vector<4xf32>
    %18 = vector.shape_cast %17 : vector<4xf32> to vector<1x4xf32>
    %19 = arith.addf %15, %18 : vector<1x4xf32>
    %c0_16 = arith.constant 0 : index
    %c0_17 = arith.constant 0 : index
    %20 = vector.load %arg6[%c0_16, %c0_17] : memref<1x4xf32, #tpu.memory_space<vmem>>, vector<1x4xf32>
    tpu.vector_store %arg6[%c0_16, %c0_17], %19 {strides = array<i32>} : memref<1x4xf32, #tpu.memory_space<vmem>>, vector<1x4xf32>,
    return
  }
  func.func @transform_0(%arg0: i32) -> (i32, i32) {
    %c0_i32 = arith.constant 0 : i32
    %c0_i32_0 = arith.constant 0 : i32
    return %arg0, %c0_i32 : i32, i32
  }
  func.func @transform_1(%arg0: i32) -> (i32, i32) {
    %c0_i32 = arith.constant 0 : i32
    %c0_i32_0 = arith.constant 0 : i32
    %c0_i32_1 = arith.constant 0 : i32
    return %c0_i32, %c0_i32_0 : i32, i32
  }
  func.func @transform_2(%arg0: i32) -> (i32, i32) {
    %c0_i32 = arith.constant 0 : i32
    %c0_i32_0 = arith.constant 0 : i32
    %c0_i32_1 = arith.constant 0 : i32
    return %c0_i32, %c0_i32_0 : i32, i32
  }
  func.func @transform_3(%arg0: i32) -> (i32, i32) {
    %c0_i32 = arith.constant 0 : i32
    %c0_i32_0 = arith.constant 0 : i32
    return %arg0, %c0_i32 : i32, i32
  }
  func.func @transform_4(%arg0: i32) -> (i32, i32) {
    %c0_i32 = arith.constant 0 : i32
    %c0_i32_0 = arith.constant 0 : i32
    %c0_i32_1 = arith.constant 0 : i32
    return %c0_i32, %c0_i32_0 : i32, i32
  }
  func.func @transform_5(%arg0: i32) -> (i32, i32) {
    %c0_i32 = arith.constant 0 : i32
    %c0_i32_0 = arith.constant 0 : i32
    %c0_i32_1 = arith.constant 0 : i32
    return %c0_i32, %c0_i32_0 : i32, i32
  }
}

module attributes {stable_mosaic.version = 11 : i64} {
  func.func @_fuse_kernel(%arg0: i32, %arg1: memref<128x4xf32, #tpu.memory_space<vmem>>, %arg2: memref<4x128x4xf32, #tpu.memory_space<vmem>>, %arg3: memref<1x4xf32, #tpu.memory_space<vmem>>, %arg4: memref<1x4xf32, #tpu.memory_space<vmem>>, %arg5: memref<4x4xf32, #tpu.memory_space<vmem>>, %arg6: memref<4x4xf32, #tpu.memory_space<vmem>>, %arg7: memref<1x4xf32, #tpu.memory_space<vmem>>, %arg8: memref<128x16xf32, #tpu.memory_space<vmem>>, %arg9: memref<1x4xf32, #tpu.memory_space<vmem>>, %arg10: memref<1x4xf32, #tpu.memory_space<vmem>>) attributes {dimension_semantics = [#tpu.dimension_semantics<arbitrary>], iteration_bounds = array<i64: 1>, scalar_prefetch = 0 : i64, scratch_operands = 0 : i64, tpu.core_type = #tpu.core_type<tc>, window_params = [{transform_indices = @transform_0, window_bounds = array<i64: 128, 4>}, {transform_indices = @transform_1, window_bounds = array<i64: 4, 128, 4>}, {pipeline_mode = #tpu.pipeline_mode<synchronous>, transform_indices = @transform_2, window_bounds = array<i64: 1, 4>}, {pipeline_mode = #tpu.pipeline_mode<synchronous>, transform_indices = @transform_3, window_bounds = array<i64: 1, 4>}, {pipeline_mode = #tpu.pipeline_mode<synchronous>, transform_indices = @transform_4, window_bounds = array<i64: 4, 4>}, {pipeline_mode = #tpu.pipeline_mode<synchronous>, transform_indices = @transform_5, window_bounds = array<i64: 4, 4>}, {pipeline_mode = #tpu.pipeline_mode<synchronous>, transform_indices = @transform_6, window_bounds = array<i64: 1, 4>}, {transform_indices = @transform_7, window_bounds = array<i64: 128, 16>}, {pipeline_mode = #tpu.pipeline_mode<synchronous>, transform_indices = @transform_8, window_bounds = array<i64: 1, 4>}, {pipeline_mode = #tpu.pipeline_mode<synchronous>, transform_indices = @transform_9, window_bounds = array<i64: 1, 4>}]} {
    %c0 = arith.constant 0 : index
    %c0_0 = arith.constant 0 : index
    %0 = vector.load %arg1[%c0, %c0_0] : memref<128x4xf32, #tpu.memory_space<vmem>>, vector<128x4xf32>
    %c0_1 = arith.constant 0 : index
    %c0_2 = arith.constant 0 : index
    %1 = vector.load %arg3[%c0_1, %c0_2] : memref<1x4xf32, #tpu.memory_space<vmem>>, vector<1x4xf32>
    %2 = vector.broadcast %1 : vector<1x4xf32> to vector<128x4xf32>
    %3 = arith.mulf %0, %2 : vector<128x4xf32>
    %c0_3 = arith.constant 0 : index
    %c0_4 = arith.constant 0 : index
    %4 = vector.load %arg4[%c0_3, %c0_4] : memref<1x4xf32, #tpu.memory_space<vmem>>, vector<1x4xf32>
    %5 = vector.broadcast %4 : vector<1x4xf32> to vector<128x4xf32>
    %6 = arith.addf %3, %5 : vector<128x4xf32>
    %cst = arith.constant 0.000000e+00 : f32
    %7 = vector.broadcast %cst : f32 to vector<128x4xf32>
    %8 = arith.maximumf %6, %7 : vector<128x4xf32>
    %c0_5 = arith.constant 0 : index
    %c0_6 = arith.constant 0 : index
    %9 = vector.load %arg5[%c0_5, %c0_6] : memref<4x4xf32, #tpu.memory_space<vmem>>, vector<4x4xf32>
    %cst_7 = arith.constant dense<0.000000e+00> : vector<128x4xf32>
    %10 = tpu.matmul %8, %9, %cst_7 {dimension_numbers = #tpu.dot_dimension_numbers<[1], [0], [0], [1], [0, 0, 1, 1], [], []>} : vector<128x4xf32>, vector<4x4xf32>, vector<128x4xf32> -> vector<128x4xf32>
    %c0_8 = arith.constant 0 : index
    %c0_9 = arith.constant 0 : index
    %11 = vector.load %arg7[%c0_8, %c0_9] : memref<1x4xf32, #tpu.memory_space<vmem>>, vector<1x4xf32>
    %12 = vector.broadcast %11 : vector<1x4xf32> to vector<128x4xf32>
    %13 = arith.addf %10, %12 : vector<128x4xf32>
    %c0_i32 = arith.constant 0 : i32
    %14 = arith.cmpi eq, %arg0, %c0_i32 : i32
    %15 = arith.extui %14 : i1 to i32
    %c0_i32_10 = arith.constant 0 : i32
    %16 = arith.cmpi ne, %15, %c0_i32_10 : i32
    scf.if %16 {
      %cst_44 = arith.constant 0.000000e+00 : f32
      %59 = vector.broadcast %cst_44 : f32 to vector<1x4xf32>
      %c0_45 = arith.constant 0 : index
      %c0_46 = arith.constant 0 : index
      %60 = vector.load %arg9[%c0_45, %c0_46] : memref<1x4xf32, #tpu.memory_space<vmem>>, vector<1x4xf32>
      tpu.vector_store %arg9[%c0_45, %c0_46], %59 {strides = array<i32>} : memref<1x4xf32, #tpu.memory_space<vmem>>, vector<1x4xf32>,
      %cst_47 = arith.constant 0.000000e+00 : f32
      %61 = vector.broadcast %cst_47 : f32 to vector<1x4xf32>
      %c0_48 = arith.constant 0 : index
      %c0_49 = arith.constant 0 : index
      %62 = vector.load %arg10[%c0_48, %c0_49] : memref<1x4xf32, #tpu.memory_space<vmem>>, vector<1x4xf32>
      tpu.vector_store %arg10[%c0_48, %c0_49], %61 {strides = array<i32>} : memref<1x4xf32, #tpu.memory_space<vmem>>, vector<1x4xf32>,
    } else {
    }
    %c0_11 = arith.constant 0 : index
    %c0_12 = arith.constant 0 : index
    %c0_13 = arith.constant 0 : index
    %17 = vector.load %arg2[%c0_11, %c0_12, %c0_13] : memref<4x128x4xf32, #tpu.memory_space<vmem>>, vector<1x128x4xf32>
    %18 = vector.shape_cast %17 : vector<1x128x4xf32> to vector<128x4xf32>
    %c0_14 = arith.constant 0 : index
    %c0_15 = arith.constant 0 : index
    %19 = vector.load %arg6[%c0_14, %c0_15] : memref<4x4xf32, #tpu.memory_space<vmem>>, vector<4x4xf32>
    %cst_16 = arith.constant dense<0.000000e+00> : vector<128x4xf32>
    %20 = tpu.matmul %18, %19, %cst_16 {dimension_numbers = #tpu.dot_dimension_numbers<[1], [0], [0], [1], [0, 0, 1, 1], [], []>} : vector<128x4xf32>, vector<4x4xf32>, vector<128x4xf32> -> vector<128x4xf32>
    %21 = arith.addf %13, %20 : vector<128x4xf32>
    %c1 = arith.constant 1 : index
    %c0_17 = arith.constant 0 : index
    %c0_18 = arith.constant 0 : index
    %22 = vector.load %arg2[%c1, %c0_17, %c0_18] : memref<4x128x4xf32, #tpu.memory_space<vmem>>, vector<1x128x4xf32>
    %23 = vector.shape_cast %22 : vector<1x128x4xf32> to vector<128x4xf32>
    %c0_19 = arith.constant 0 : index
    %c0_20 = arith.constant 0 : index
    %24 = vector.load %arg6[%c0_19, %c0_20] : memref<4x4xf32, #tpu.memory_space<vmem>>, vector<4x4xf32>
    %cst_21 = arith.constant dense<0.000000e+00> : vector<128x4xf32>
    %25 = tpu.matmul %23, %24, %cst_21 {dimension_numbers = #tpu.dot_dimension_numbers<[1], [0], [0], [1], [0, 0, 1, 1], [], []>} : vector<128x4xf32>, vector<4x4xf32>, vector<128x4xf32> -> vector<128x4xf32>
    %26 = arith.addf %13, %25 : vector<128x4xf32>
    %c2 = arith.constant 2 : index
    %c0_22 = arith.constant 0 : index
    %c0_23 = arith.constant 0 : index
    %27 = vector.load %arg2[%c2, %c0_22, %c0_23] : memref<4x128x4xf32, #tpu.memory_space<vmem>>, vector<1x128x4xf32>
    %28 = vector.shape_cast %27 : vector<1x128x4xf32> to vector<128x4xf32>
    %c0_24 = arith.constant 0 : index
    %c0_25 = arith.constant 0 : index
    %29 = vector.load %arg6[%c0_24, %c0_25] : memref<4x4xf32, #tpu.memory_space<vmem>>, vector<4x4xf32>
    %cst_26 = arith.constant dense<0.000000e+00> : vector<128x4xf32>
    %30 = tpu.matmul %28, %29, %cst_26 {dimension_numbers = #tpu.dot_dimension_numbers<[1], [0], [0], [1], [0, 0, 1, 1], [], []>} : vector<128x4xf32>, vector<4x4xf32>, vector<128x4xf32> -> vector<128x4xf32>
    %31 = arith.addf %13, %30 : vector<128x4xf32>
    %c3 = arith.constant 3 : index
    %c0_27 = arith.constant 0 : index
    %c0_28 = arith.constant 0 : index
    %32 = vector.load %arg2[%c3, %c0_27, %c0_28] : memref<4x128x4xf32, #tpu.memory_space<vmem>>, vector<1x128x4xf32>
    %33 = vector.shape_cast %32 : vector<1x128x4xf32> to vector<128x4xf32>
    %c0_29 = arith.constant 0 : index
    %c0_30 = arith.constant 0 : index
    %34 = vector.load %arg6[%c0_29, %c0_30] : memref<4x4xf32, #tpu.memory_space<vmem>>, vector<4x4xf32>
    %cst_31 = arith.constant dense<0.000000e+00> : vector<128x4xf32>
    %35 = tpu.matmul %33, %34, %cst_31 {dimension_numbers = #tpu.dot_dimension_numbers<[1], [0], [0], [1], [0, 0, 1, 1], [], []>} : vector<128x4xf32>, vector<4x4xf32>, vector<128x4xf32> -> vector<128x4xf32>
    %36 = arith.addf %13, %35 : vector<128x4xf32>
    %37 = tpu.concatenate %21, %26, %31, %36 in 1 : vector<128x4xf32>, vector<128x4xf32>, vector<128x4xf32>, vector<128x4xf32> -> vector<128x16xf32>
    %c0_32 = arith.constant 0 : index
    %c0_33 = arith.constant 0 : index
    %38 = vector.load %arg8[%c0_32, %c0_33] : memref<128x16xf32, #tpu.memory_space<vmem>>, vector<128x16xf32>
    tpu.vector_store %arg8[%c0_32, %c0_33], %37 {strides = array<i32>} : memref<128x16xf32, #tpu.memory_space<vmem>>, vector<128x16xf32>,
    %c0_34 = arith.constant 0 : index
    %c0_35 = arith.constant 0 : index
    %39 = vector.load %arg9[%c0_34, %c0_35] : memref<1x4xf32, #tpu.memory_space<vmem>>, vector<1x4xf32>
    %40 = arith.addf %21, %26 : vector<128x4xf32>
    %41 = arith.addf %31, %36 : vector<128x4xf32>
    %42 = arith.addf %40, %41 : vector<128x4xf32>
    %cst_36 = arith.constant dense<0.000000e+00> : vector<4xf32>
    %43 = vector.multi_reduction <add>, %42, %cst_36 [0] : vector<128x4xf32> to vector<4xf32>
    %44 = vector.shape_cast %43 : vector<4xf32> to vector<1x4xf32>
    %45 = arith.addf %39, %44 : vector<1x4xf32>
    %c0_37 = arith.constant 0 : index
    %c0_38 = arith.constant 0 : index
    %46 = vector.load %arg9[%c0_37, %c0_38] : memref<1x4xf32, #tpu.memory_space<vmem>>, vector<1x4xf32>
    tpu.vector_store %arg9[%c0_37, %c0_38], %45 {strides = array<i32>} : memref<1x4xf32, #tpu.memory_space<vmem>>, vector<1x4xf32>,
    %c0_39 = arith.constant 0 : index
    %c0_40 = arith.constant 0 : index
    %47 = vector.load %arg10[%c0_39, %c0_40] : memref<1x4xf32, #tpu.memory_space<vmem>>, vector<1x4xf32>
    %48 = arith.mulf %21, %21 : vector<128x4xf32>
    %49 = arith.mulf %26, %26 : vector<128x4xf32>
    %50 = arith.addf %48, %49 : vector<128x4xf32>
    %51 = arith.mulf %31, %31 : vector<128x4xf32>
    %52 = arith.mulf %36, %36 : vector<128x4xf32>
    %53 = arith.addf %51, %52 : vector<128x4xf32>
    %54 = arith.addf %50, %53 : vector<128x4xf32>
    %cst_41 = arith.constant dense<0.000000e+00> : vector<4xf32>
    %55 = vector.multi_reduction <add>, %54, %cst_41 [0] : vector<128x4xf32> to vector<4xf32>
    %56 = vector.shape_cast %55 : vector<4xf32> to vector<1x4xf32>
    %57 = arith.addf %47, %56 : vector<1x4xf32>
    %c0_42 = arith.constant 0 : index
    %c0_43 = arith.constant 0 : index
    %58 = vector.load %arg10[%c0_42, %c0_43] : memref<1x4xf32, #tpu.memory_space<vmem>>, vector<1x4xf32>
    tpu.vector_store %arg10[%c0_42, %c0_43], %57 {strides = array<i32>} : memref<1x4xf32, #tpu.memory_space<vmem>>, vector<1x4xf32>,
    return
  }
  func.func @transform_0(%arg0: i32) -> (i32, i32) {
    %c0_i32 = arith.constant 0 : i32
    %c0_i32_0 = arith.constant 0 : i32
    return %arg0, %c0_i32 : i32, i32
  }
  func.func @transform_1(%arg0: i32) -> (i32, i32, i32) {
    %c0_i32 = arith.constant 0 : i32
    %c0_i32_0 = arith.constant 0 : i32
    %c0_i32_1 = arith.constant 0 : i32
    return %c0_i32, %arg0, %c0_i32_0 : i32, i32, i32
  }
  func.func @transform_2(%arg0: i32) -> (i32, i32) {
    %c0_i32 = arith.constant 0 : i32
    %c0_i32_0 = arith.constant 0 : i32
    %c0_i32_1 = arith.constant 0 : i32
    return %c0_i32, %c0_i32_0 : i32, i32
  }
  func.func @transform_3(%arg0: i32) -> (i32, i32) {
    %c0_i32 = arith.constant 0 : i32
    %c0_i32_0 = arith.constant 0 : i32
    %c0_i32_1 = arith.constant 0 : i32
    return %c0_i32, %c0_i32_0 : i32, i32
  }
  func.func @transform_4(%arg0: i32) -> (i32, i32) {
    %c0_i32 = arith.constant 0 : i32
    %c0_i32_0 = arith.constant 0 : i32
    %c0_i32_1 = arith.constant 0 : i32
    return %c0_i32, %c0_i32_0 : i32, i32
  }
  func.func @transform_5(%arg0: i32) -> (i32, i32) {
    %c0_i32 = arith.constant 0 : i32
    %c0_i32_0 = arith.constant 0 : i32
    %c0_i32_1 = arith.constant 0 : i32
    return %c0_i32, %c0_i32_0 : i32, i32
  }
  func.func @transform_6(%arg0: i32) -> (i32, i32) {
    %c0_i32 = arith.constant 0 : i32
    %c0_i32_0 = arith.constant 0 : i32
    %c0_i32_1 = arith.constant 0 : i32
    return %c0_i32, %c0_i32_0 : i32, i32
  }
  func.func @transform_7(%arg0: i32) -> (i32, i32) {
    %c0_i32 = arith.constant 0 : i32
    %c0_i32_0 = arith.constant 0 : i32
    return %arg0, %c0_i32 : i32, i32
  }
  func.func @transform_8(%arg0: i32) -> (i32, i32) {
    %c0_i32 = arith.constant 0 : i32
    %c0_i32_0 = arith.constant 0 : i32
    %c0_i32_1 = arith.constant 0 : i32
    return %c0_i32, %c0_i32_0 : i32, i32
  }
  func.func @transform_9(%arg0: i32) -> (i32, i32) {
    %c0_i32 = arith.constant 0 : i32
    %c0_i32_0 = arith.constant 0 : i32
    %c0_i32_1 = arith.constant 0 : i32
    return %c0_i32, %c0_i32_0 : i32, i32
  }
}

module attributes {stable_mosaic.version = 11 : i64} {
  func.func @_bn_apply_kernel(%arg0: i32, %arg1: memref<16x128xf32, #tpu.memory_space<vmem>>, %arg2: memref<1x128xf32, #tpu.memory_space<vmem>>, %arg3: memref<1x128xf32, #tpu.memory_space<vmem>>, %arg4: memref<16x128xf32, #tpu.memory_space<vmem>>) attributes {dimension_semantics = [#tpu.dimension_semantics<parallel>], iteration_bounds = array<i64: 1>, scalar_prefetch = 0 : i64, scratch_operands = 0 : i64, tpu.core_type = #tpu.core_type<tc>, window_params = [{transform_indices = @transform_0, window_bounds = array<i64: 16, 128>}, {pipeline_mode = #tpu.pipeline_mode<synchronous>, transform_indices = @transform_1, window_bounds = array<i64: 1, 128>}, {pipeline_mode = #tpu.pipeline_mode<synchronous>, transform_indices = @transform_2, window_bounds = array<i64: 1, 128>}, {transform_indices = @transform_3, window_bounds = array<i64: 16, 128>}]} {
    %c0 = arith.constant 0 : index
    %c0_0 = arith.constant 0 : index
    %0 = vector.load %arg1[%c0, %c0_0] : memref<16x128xf32, #tpu.memory_space<vmem>>, vector<16x128xf32>
    %c0_1 = arith.constant 0 : index
    %c0_2 = arith.constant 0 : index
    %1 = vector.load %arg2[%c0_1, %c0_2] : memref<1x128xf32, #tpu.memory_space<vmem>>, vector<1x128xf32>
    %2 = vector.broadcast %1 : vector<1x128xf32> to vector<16x128xf32>
    %3 = arith.mulf %0, %2 : vector<16x128xf32>
    %c0_3 = arith.constant 0 : index
    %c0_4 = arith.constant 0 : index
    %4 = vector.load %arg3[%c0_3, %c0_4] : memref<1x128xf32, #tpu.memory_space<vmem>>, vector<1x128xf32>
    %5 = vector.broadcast %4 : vector<1x128xf32> to vector<16x128xf32>
    %6 = arith.addf %3, %5 : vector<16x128xf32>
    %c0_5 = arith.constant 0 : index
    %c0_6 = arith.constant 0 : index
    %7 = vector.load %arg4[%c0_5, %c0_6] : memref<16x128xf32, #tpu.memory_space<vmem>>, vector<16x128xf32>
    tpu.vector_store %arg4[%c0_5, %c0_6], %6 {strides = array<i32>} : memref<16x128xf32, #tpu.memory_space<vmem>>, vector<16x128xf32>,
    return
  }
  func.func @transform_0(%arg0: i32) -> (i32, i32) {
    %c0_i32 = arith.constant 0 : i32
    %c0_i32_0 = arith.constant 0 : i32
    return %arg0, %c0_i32 : i32, i32
  }
  func.func @transform_1(%arg0: i32) -> (i32, i32) {
    %c0_i32 = arith.constant 0 : i32
    %c0_i32_0 = arith.constant 0 : i32
    %c0_i32_1 = arith.constant 0 : i32
    return %c0_i32, %c0_i32_0 : i32, i32
  }
  func.func @transform_2(%arg0: i32) -> (i32, i32) {
    %c0_i32 = arith.constant 0 : i32
    %c0_i32_0 = arith.constant 0 : i32
    %c0_i32_1 = arith.constant 0 : i32
    return %c0_i32, %c0_i32_0 : i32, i32
  }
  func.func @transform_3(%arg0: i32) -> (i32, i32) {
    %c0_i32 = arith.constant 0 : i32
    %c0_i32_0 = arith.constant 0 : i32
    return %arg0, %c0_i32 : i32, i32
  }
}

</mosaic_0001>

<bundles_post_ra>
// kernel: tile.10
= control target key start
LH: loop header
LB: loop body
LE: loop exit
PB: predicated region body
PF: predicated region fallthrough
CT: control target
= control target key end

     0   :  { %s40_s0 = inlined_call_operand.vmem [shape: f32[4], index: 0, kind: input, shape index: {}]   ;;  %s41_s1 = inlined_call_operand.vmem [shape: f32[32,4], index: 1, kind: output, shape index: {}]  }
   0x1   :  { %v4_v0 = vld [vmem:[%s40_s0] ss:$0 sm:$0xff] }
   0x2   :  { %5 = vst [vmem:[%s41_s1] sm:$0xff] %v4_v0  ;;  %12 = vst [vmem:[%s41_s1 + $0x8] sm:$0xff] %v4_v0 }
   0x3   :  { %13 = vst [vmem:[%s41_s1 + $0x10] sm:$0xff] %v4_v0  ;;  %14 = vst [vmem:[%s41_s1 + $0x18] sm:$0xff] %v4_v0 }

// kernel: tile.11
= control target key start
LH: loop header
LB: loop body
LE: loop exit
PB: predicated region body
PF: predicated region fallthrough
CT: control target
= control target key end

     0   :  { %s259_s10 = smov 124   ;;  %s260_s11 = smov 116   ;;  %vm3_vm0 = vcmask 31744   ;;  %vm9_vm1 = vcmask 1048544   ;;  %vm15_vm2 = vcmask 1015744   ;;  %vm21_vm3 = vcmask 982944   ;;  %s399_s0 = inlined_call_operand.vmem [shape: f32[32,4], index: 0, kind: input, shape index: {}]   ;;  %s400_s1 = inlined_call_operand.vmem [shape: f32[1,128], index: 1, kind: output, shape index: {}]  }
   0x1   :  { %v197_v0 = vld [vmem:[%s399_s0 + $0x1f] sm:$0x1]   ;;  %v199_v1 = vld [vmem:[%s399_s0 + $0x1d] sm:$0x1]   ;;  %v198_v2 = vld [vmem:[%s399_s0 + $0x1e] sm:$0x1]  }
   0x2   :  { %7 = vrot.lane.b32.xlu0 %v197_v0, %s259_s10  ;;  %19 = vrot.lane.b32.xlu1 %v199_v1, %s260_s11  ;;  %v200_v3 = vld [vmem:[%s399_s0 + $0x1c] sm:$0x1]   ;;  %s261_s16 = smov 120   ;;  %s262_s17 = smov 112   ;;  %v201_v4 = vld [vmem:[%s399_s0 + $0x1b] sm:$0x1]  }
   0x3   :  { %v202_v5 = vld [vmem:[%s399_s0 + $0x1a] sm:$0x1]   ;;  %s263_s22 = smov 108   ;;  %s264_s23 = smov 104   ;;  %v203_v6 = vld [vmem:[%s399_s0 + $0x19] sm:$0x1]  }
   0x4   :  { %v204_v7 = vld [vmem:[%s399_s0 + $0x18] sm:$0x1]   ;;  %s265_s28 = smov 100   ;;  %s266_s29 = smov 96   ;;  %v205_v8 = vld [vmem:[%s399_s0 + $0x17] sm:$0x1]  }
   0x5   :  { %v206_v9 = vld [vmem:[%s399_s0 + $0x16] sm:$0x1]   ;;  %v2_v10 = vld [vmem:[%s399_s0] sm:$0x1]   ;;  %s267_s7 = smov 92   ;;  %s268_s8 = smov 88  }
   0x6   :  { %13 = vrot.lane.b32.xlu0 %v198_v2, %s261_s16  ;;  %25 = vrot.lane.b32.xlu1 %v200_v3, %s262_s17  ;;  %4 = vst.msk [vmem:[#allocation0] sm:$0x1] %vm3_vm0, %v2_v10   ;;  %v207_v11 = vld [vmem:[%s399_s0 + $0x15] sm:$0x1]   ;;  %v208_v12 = vld [vmem:[%s399_s0 + $0x14] sm:$0x1]  }
   0x7   :  { %s269_s13 = smov 84   ;;  %s270_s14 = smov 80   ;;  %v209_v13 = vld [vmem:[%s399_s0 + $0x13] sm:$0x1]   ;;  %v210_v14 = vld [vmem:[%s399_s0 + $0x12] sm:$0x1]  }
   0x8   :  { %s271_s19 = smov 76   ;;  %s272_s20 = smov 72   ;;  %v211_v15 = vld [vmem:[%s399_s0 + $0x11] sm:$0x1]   ;;  %v212_v16 = vld [vmem:[%s399_s0 + $0x10] sm:$0x1]  }
   0x9   :  { %s273_s25 = smov 68   ;;  %s274_s26 = smov 64   ;;  %v213_v17 = vld [vmem:[%s399_s0 + $0xf] sm:$0x1]   ;;  %v214_v18 = vld [vmem:[%s399_s0 + $0xe] sm:$0x1]  }
   0xa   :  { %31 = vrot.lane.b32.xlu0 %v201_v4, %s263_s22  ;;  %37 = vrot.lane.b32.xlu1 %v202_v5, %s264_s23  ;;  %s275_s2 = smov 60   ;;  %s276_s3 = smov 56   ;;  %v215_v19 = vld [vmem:[%s399_s0 + $0xd] sm:$0x1]   ;;  %v216_v20 = vld [vmem:[%s399_s0 + $0xc] sm:$0x1]  }
   0xb   :  { %s278_s9 = smov 48   ;;  %v217_v21 = vld [vmem:[%s399_s0 + $0xb] sm:$0x1]   ;;  %v218_v22 = vld [vmem:[%s399_s0 + $0xa] sm:$0x1]   ;;  %s280_s15 = smov 40  }
   0xc   :  { %v219_v23 = vld [vmem:[%s399_s0 + $0x9] sm:$0x1]   ;;  %v220_v24 = vld [vmem:[%s399_s0 + $0x8] sm:$0x1]   ;;  %s282_s21 = smov 32   ;;  %s284_s27 = smov 24  }
   0xd   :  { %v221_v25 = vld [vmem:[%s399_s0 + $0x7] sm:$0x1]   ;;  %v222_v26 = vld [vmem:[%s399_s0 + $0x6] sm:$0x1]   ;;  %v223_v27 = vld [vmem:[%s399_s0 + $0x5] sm:$0x1]  }
   0xe   :  { %43 = vrot.lane.b32.xlu0 %v203_v6, %s265_s28  ;;  %49 = vrot.lane.b32.xlu1 %v204_v7, %s266_s29  ;;  %v224_v28 = vld [vmem:[%s399_s0 + $0x4] sm:$0x1]   ;;  %s286_s4 = smov 16   ;;  %v225_v29 = vld [vmem:[%s399_s0 + $0x3] sm:$0x1]   ;;  %s288_s10 = smov 8  }
   0xf   :  { %v226_v30 = vld [vmem:[%s399_s0 + $0x2] sm:$0x1]   ;;  %v227_v31 = vld [vmem:[%s399_s0 + $0x1] sm:$0x1]   ;;  %s289_s0 = smov 4   ;;  %vm27_vm4 = vcmask 950144  }
  0x10   :  { %vm33_vm5 = vcmask 917344   ;;  %vm39_vm6 = vcmask 884544   ;;  %vm45_vm7 = vcmask 851744   ;;  %vm51_vm8 = vcmask 818944  }
  0x11   :  { %vm57_vm9 = vcmask 786144   ;;  %vm63_vm10 = vcmask 753344   ;;  %vm69_vm11 = vcmask 720544   ;;  %vm75_vm12 = vcmask 687744  }
  0x12   :  { %55 = vrot.lane.b32.xlu0 %v205_v8, %s267_s7  ;;  %61 = vrot.lane.b32.xlu1 %v206_v9, %s268_s8  ;;  %s277_s8 = smov 52   ;;  %vm81_vm13 = vcmask 654944   ;;  %vm87_vm14 = vcmask 622144   ;;  %vm93_vm15 = vcmask 589344   ;;  %vm99_vm0 = vcmask 556544  }
  0x16   :  { %67 = vrot.lane.b32.xlu0 %v207_v11, %s269_s13  ;;  %73 = vrot.lane.b32.xlu1 %v208_v12, %s270_s14  ;;  %s279_s14 = smov 44  }
  0x1a   :  { %79 = vrot.lane.b32.xlu0 %v209_v13, %s271_s19  ;;  %85 = vrot.lane.b32.xlu1 %v210_v14, %s272_s20  ;;  %s281_s20 = smov 36  }
  0x1e   :  { %91 = vrot.lane.b32.xlu0 %v211_v15, %s273_s25  ;;  %97 = vrot.lane.b32.xlu1 %v212_v16, %s274_s26  ;;  %s283_s26 = smov 28  }
  0x22   :  { %103 = vrot.lane.b32.xlu0 %v213_v17, %s275_s2  ;;  %109 = vrot.lane.b32.xlu1 %v214_v18, %s276_s3  ;;  %s285_s3 = smov 20  }
  0x26   :  { %115 = vrot.lane.b32.xlu0 %v215_v19, %s277_s8  ;;  %121 = vrot.lane.b32.xlu1 %v216_v20, %s278_s9  ;;  %s287_s9 = smov 12  }
  0x2a   :  { %127 = vrot.lane.b32.xlu0 %v217_v21, %s279_s14  ;;  %133 = vrot.lane.b32.xlu1 %v218_v22, %s280_s15 }
  0x2e   :  { %139 = vrot.lane.b32.xlu0 %v219_v23, %s281_s20  ;;  %145 = vrot.lane.b32.xlu1 %v220_v24, %s282_s21 }
  0x32   :  { %151 = vrot.lane.b32.xlu0 %v221_v25, %s283_s26  ;;  %157 = vrot.lane.b32.xlu1 %v222_v26, %s284_s27 }
  0x36   :  { %163 = vrot.lane.b32.xlu0 %v223_v27, %s285_s3  ;;  %169 = vrot.lane.b32.xlu1 %v224_v28, %s286_s4 }
  0x3a   :  { %175 = vrot.lane.b32.xlu0 %v225_v29, %s287_s9  ;;  %181 = vrot.lane.b32.xlu1 %v226_v30, %s288_s10 }
  0x3e   :  { %187 = vrot.lane.b32.xlu0 %v227_v31, %s289_s0 }
  0x74   :  { %v8_v32 = vpop.permute.xlu0 %7   ;;  %v20_v33 = vpop.permute.xlu1 %19  }
  0x75   :  { %10 = vst.msk [vmem:[#allocation0] sm:$0x1] %vm9_vm1, %v8_v32   ;;  %vm105_vm1 = vcmask 523744  }
  0x78   :  { %v14_v34 = vpop.permute.xlu0 %13   ;;  %v26_v35 = vpop.permute.xlu1 %25  }
  0x79   :  { %16 = vst.msk [vmem:[#allocation0] sm:$0x1] %vm15_vm2, %v14_v34   ;;  %vm111_vm2 = vcmask 490944  }
  0x7a   :  { %22 = vst.msk [vmem:[#allocation0] sm:$0x1] %vm21_vm3, %v20_v33   ;;  %vm117_vm3 = vcmask 458144  }
  0x7b   :  { %28 = vst.msk [vmem:[#allocation0] sm:$0x1] %vm27_vm4, %v26_v35   ;;  %vm123_vm4 = vcmask 425344  }
  0x7c   :  { %v32_v36 = vpop.permute.xlu0 %31   ;;  %v38_v37 = vpop.permute.xlu1 %37  }
  0x7d   :  { %34 = vst.msk [vmem:[#allocation0] sm:$0x1] %vm33_vm5, %v32_v36   ;;  %vm129_vm5 = vcmask 392544  }
  0x7e   :  { %40 = vst.msk [vmem:[#allocation0] sm:$0x1] %vm39_vm6, %v38_v37   ;;  %vm135_vm6 = vcmask 359744  }
  0x80   :  { %v44_v38 = vpop.permute.xlu0 %43   ;;  %v50_v39 = vpop.permute.xlu1 %49  }
  0x81   :  { %46 = vst.msk [vmem:[#allocation0] sm:$0x1] %vm45_vm7, %v44_v38   ;;  %vm141_vm7 = vcmask 326944  }
  0x82   :  { %52 = vst.msk [vmem:[#allocation0] sm:$0x1] %vm51_vm8, %v50_v39   ;;  %vm147_vm8 = vcmask 294144  }
  0x84   :  { %v56_v40 = vpop.permute.xlu0 %55   ;;  %v62_v41 = vpop.permute.xlu1 %61  }
  0x85   :  { %58 = vst.msk [vmem:[#allocation0] sm:$0x1] %vm57_vm9, %v56_v40   ;;  %vm153_vm9 = vcmask 261344  }
  0x86   :  { %64 = vst.msk [vmem:[#allocation0] sm:$0x1] %vm63_vm10, %v62_v41   ;;  %vm159_vm10 = vcmask 228544  }
  0x88   :  { %v68_v42 = vpop.permute.xlu0 %67   ;;  %v74_v43 = vpop.permute.xlu1 %73  }
  0x89   :  { %70 = vst.msk [vmem:[#allocation0] sm:$0x1] %vm69_vm11, %v68_v42   ;;  %vm165_vm11 = vcmask 195744  }
  0x8a   :  { %76 = vst.msk [vmem:[#allocation0] sm:$0x1] %vm75_vm12, %v74_v43   ;;  %vm171_vm12 = vcmask 162944  }
  0x8c   :  { %v80_v44 = vpop.permute.xlu0 %79   ;;  %v86_v45 = vpop.permute.xlu1 %85  }
  0x8d   :  { %82 = vst.msk [vmem:[#allocation0] sm:$0x1] %vm81_vm13, %v80_v44   ;;  %vm177_vm13 = vcmask 130144  }
  0x8e   :  { %88 = vst.msk [vmem:[#allocation0] sm:$0x1] %vm87_vm14, %v86_v45   ;;  %vm183_vm14 = vcmask 97344  }
  0x90   :  { %v92_v46 = vpop.permute.xlu0 %91   ;;  %v98_v47 = vpop.permute.xlu1 %97  }
  0x91   :  { %94 = vst.msk [vmem:[#allocation0] sm:$0x1] %vm93_vm15, %v92_v46   ;;  %vm189_vm15 = vcmask 64544  }
  0x92   :  { %100 = vst.msk [vmem:[#allocation0] sm:$0x1] %vm99_vm0, %v98_v47  }
  0x94   :  { %v104_v48 = vpop.permute.xlu0 %103   ;;  %v110_v49 = vpop.permute.xlu1 %109  }
  0x95   :  { %106 = vst.msk [vmem:[#allocation0] sm:$0x1] %vm105_vm1, %v104_v48  }
  0x96   :  { %112 = vst.msk [vmem:[#allocation0] sm:$0x1] %vm111_vm2, %v110_v49  }
  0x98   :  { %v116_v50 = vpop.permute.xlu0 %115   ;;  %v122_v51 = vpop.permute.xlu1 %121  }
  0x99   :  { %118 = vst.msk [vmem:[#allocation0] sm:$0x1] %vm117_vm3, %v116_v50  }
  0x9a   :  { %124 = vst.msk [vmem:[#allocation0] sm:$0x1] %vm123_vm4, %v122_v51  }
  0x9c   :  { %v128_v52 = vpop.permute.xlu0 %127   ;;  %v134_v53 = vpop.permute.xlu1 %133  }
  0x9d   :  { %130 = vst.msk [vmem:[#allocation0] sm:$0x1] %vm129_vm5, %v128_v52  }
  0x9e   :  { %136 = vst.msk [vmem:[#allocation0] sm:$0x1] %vm135_vm6, %v134_v53  }
  0xa0   :  { %v140_v54 = vpop.permute.xlu0 %139   ;;  %v146_v55 = vpop.permute.xlu1 %145  }
  0xa1   :  { %142 = vst.msk [vmem:[#allocation0] sm:$0x1] %vm141_vm7, %v140_v54  }
  0xa2   :  { %148 = vst.msk [vmem:[#allocation0] sm:$0x1] %vm147_vm8, %v146_v55  }
  0xa4   :  { %v152_v56 = vpop.permute.xlu0 %151   ;;  %v158_v57 = vpop.permute.xlu1 %157  }
  0xa5   :  { %154 = vst.msk [vmem:[#allocation0] sm:$0x1] %vm153_vm9, %v152_v56  }
  0xa6   :  { %160 = vst.msk [vmem:[#allocation0] sm:$0x1] %vm159_vm10, %v158_v57  }
  0xa8   :  { %v164_v58 = vpop.permute.xlu0 %163   ;;  %v170_v59 = vpop.permute.xlu1 %169  }
  0xa9   :  { %166 = vst.msk [vmem:[#allocation0] sm:$0x1] %vm165_vm11, %v164_v58  }
  0xaa   :  { %172 = vst.msk [vmem:[#allocation0] sm:$0x1] %vm171_vm12, %v170_v59  }
  0xac   :  { %v176_v60 = vpop.permute.xlu0 %175   ;;  %v182_v61 = vpop.permute.xlu1 %181  }
  0xad   :  { %178 = vst.msk [vmem:[#allocation0] sm:$0x1] %vm177_vm13, %v176_v60  }
  0xae   :  { %184 = vst.msk [vmem:[#allocation0] sm:$0x1] %vm183_vm14, %v182_v61  }
  0xb0   :  { %v188_v62 = vpop.permute.xlu0 %187  }
  0xb1   :  { %190 = vst.msk [vmem:[#allocation0] sm:$0x1] %vm189_vm15, %v188_v62  }
  0xb8   :  { %v194_v63 = vld [vmem:[#allocation0] sm:$0x1] }
  0xb9   :  { %196 = vst [vmem:[%s400_s1] sm:$0x1] %v194_v63 }

// kernel: combine_layers_forward.3
= control target key start
LH: loop header
LB: loop body
LE: loop exit
PB: predicated region body
PF: predicated region fallthrough
CT: control target
= control target key end

     0   :  { %vm41_vm0 = vcmask 64512   ;;  %vm256_vm1 = vcmask 24576   ;;  %v431_v17 = vmov 0.0   ;;  %vm235_vm2 = vcmask 31744   ;;  %s686_s1 = inlined_call_operand.vmem [shape: f32[8,4], index: 1, kind: input, shape index: {}]   ;;  %s687_s0 = inlined_call_operand.vmem [shape: f32[128,8], index: 0, kind: input, shape index: {}]   ;;  %s688_s4 = inlined_call_operand.vmem [shape: f32[1,4], index: 4, kind: output, shape index: {1}]   ;;  %s689_s5 = inlined_call_operand.vmem [shape: f32[1,4], index: 5, kind: output, shape index: {2}]   ;;  %s690_s2 = inlined_call_operand.vmem [shape: f32[1,4], index: 2, kind: input, shape index: {}]   ;;  %s691_s3 = inlined_call_operand.vmem [shape: f32[128,4], index: 3, kind: output, shape index: {0}]  }
   0x1   :  { %v33_v0 = vld [vmem:[%s686_s1] sm:$0xff]  ;;  %v18_v2 = vld [vmem:[%s687_s0 + $0x8] sm:$0xff]  ;;  %v19_v3 = vld [vmem:[%s687_s0 + $0x10] sm:$0xff]  ;;  %257 = vst.msk [vmem:[%s688_s4] sm:$0x1] %vm256_vm1, %v431_v17 }
   0x2   :  { %v17_v1 = vld [vmem:[%s687_s0] sm:$0xff]  ;;  %402 = vmatprep.subr.mxu0 %v33_v0  ;;  %428 = vmatprep.subr.mxu1 %v33_v0  ;;  %v26_v5 = vld [vmem:[%s687_s0 + $0x48] sm:$0xff]  ;;  %v27_v6 = vld [vmem:[%s687_s0 + $0x50] sm:$0xff]  ;;  %258 = vst.msk [vmem:[%s689_s5] sm:$0x1] %vm256_vm1, %v431_v17 }
   0x3   :  { %404 = vmatprep.mubr.msk.f32.mxu0 %vm41_vm0, %v17_v1  ;;  %403 = vmatpush3.msra.mxu0 %v33_v0  ;;  %v25_v4 = vld [vmem:[%s687_s0 + $0x40] sm:$0xff]  ;;  %v20_v7 = vld [vmem:[%s687_s0 + $0x18] sm:$0xff]  ;;  %v22_v11 = vld [vmem:[%s687_s0 + $0x28] sm:$0xff] }
   0x4   :  { %405 = vmatmul.mubr.msk.f32.vlgmr.msra.gmra.mrb[0].mxu0 %vm41_vm0, %v18_v2  ;;  %429 = vmatpush3.msra.mxu1 %v33_v0  ;;  %v21_v8 = vld [vmem:[%s687_s0 + $0x20] sm:$0xff]  ;;  %v28_v9 = vld [vmem:[%s687_s0 + $0x58] sm:$0xff]  ;;  %v23_v12 = vld [vmem:[%s687_s0 + $0x30] sm:$0xff] }
   0x5   :  { %407 = vmatprep.mubr.msk.f32.mxu0 %vm41_vm0, %v19_v3  ;;  %416 = vmatprep.mubr.msk.f32.mxu1 %vm41_vm0, %v25_v4  ;;  %v29_v10 = vld [vmem:[%s687_s0 + $0x60] sm:$0xff]  ;;  %v30_v13 = vld [vmem:[%s687_s0 + $0x68] sm:$0xff]  ;;  %v31_v14 = vld [vmem:[%s687_s0 + $0x70] sm:$0xff] }
   0x6   :  { %417 = vmatmul.mubr.msk.f32.vlgmr.msra.gmra.mrb[0].mxu1 %vm41_vm0, %v26_v5  ;;  %v24_v15 = vld [vmem:[%s687_s0 + $0x38] sm:$0xff]  ;;  %v540_v18 = vld [vmem:[%s690_s2] ss:$0 sm:$0xff] }
   0x7   :  { %419 = vmatprep.mubr.msk.f32.mxu1 %vm41_vm0, %v27_v6  ;;  %v32_v16 = vld [vmem:[%s687_s0 + $0x78] sm:$0xff] }
   0x8   :  { %408 = vmatmul.mubr.msk.f32.gmra.mrb[2].mxu0 %vm41_vm0, %v20_v7 }
   0x9   :  { %410 = vmatprep.mubr.msk.f32.mxu0 %vm41_vm0, %v21_v8 }
   0xa   :  { %420 = vmatmul.mubr.msk.f32.gmra.mrb[2].mxu1 %vm41_vm0, %v28_v9 }
   0xb   :  { %422 = vmatprep.mubr.msk.f32.mxu1 %vm41_vm0, %v29_v10 }
   0xc   :  { %411 = vmatmul.mubr.msk.f32.gmra.mrb[4].mxu0 %vm41_vm0, %v22_v11 }
   0xd   :  { %413 = vmatprep.mubr.msk.f32.mxu0 %vm41_vm0, %v23_v12 }
   0xe   :  { %423 = vmatmul.mubr.msk.f32.gmra.mrb[4].mxu1 %vm41_vm0, %v30_v13 }
   0xf   :  { %425 = vmatprep.mubr.msk.f32.mxu1 %vm41_vm0, %v31_v14 }
  0x10   :  { %414 = vmatmul.mubr.msk.f32.gmra.mrb[6].mxu0 %vm41_vm0, %v24_v15 }
  0x12   :  { %426 = vmatmul.mubr.msk.f32.gmra.mrb[6].mxu1 %vm41_vm0, %v32_v16 }
  0xd7   :  { %v406_v19 = vpop.f32.mrb[0].mxu0 }
  0xd8   :  { %v162_v20 = vadd.f32 %v406_v19, %v540_v18  ;;  %v156_v21 = vpop.f32.mrb[1].mxu0 }
  0xd9   :  { %v157_v22 = vadd.f32 %v540_v18, %v156_v21  ;;  %v418_v23 = vpop.f32.mrb[0].mxu1 }
  0xda   :  { %237 = vst.msk [vmem:[%s691_s3 + $0x8] sm:$0xff] %vm235_vm2, %v162_v20  ;;  %v261_v24 = vsel %vm235_vm2, %v162_v20, 0.0  ;;  %v302_v25 = vmul.f32 %v162_v20, %v162_v20  ;;  %v550_v26 = vadd.f32 %v418_v23, %v540_v18  ;;  %v196_v27 = vpop.f32.mrb[1].mxu1 }
  0xdb   :  { %236 = vst.msk [vmem:[%s691_s3] sm:$0xff] %vm235_vm2, %v157_v22  ;;  %v260_v28 = vsel %vm235_vm2, %v157_v22, 0.0  ;;  %v301_v29 = vmul.f32 %v157_v22, %v157_v22  ;;  %v409_v30 = vpop.f32.mrb[2].mxu0  ;;  %v558_v31 = vadd.f32 %v540_v18, %v196_v27 }
  0xdc   :  { %v318_v32 = vsel %vm235_vm2, %v302_v25, 0.0  ;;  %v262_v33 = vadd.f32 %v261_v24, %v260_v28  ;;  %v172_v34 = vadd.f32 %v409_v30, %v540_v18  ;;  %v166_v35 = vpop.f32.mrb[3].mxu0  ;;  %245 = vst.msk [vmem:[%s691_s3 + $0x48] sm:$0xff] %vm235_vm2, %v550_v26  ;;  %v310_v24 = vmul.f32 %v550_v26, %v550_v26 }
  0xdd   :  { %v317_v36 = vsel %vm235_vm2, %v301_v29, 0.0  ;;  %v167_v37 = vadd.f32 %v540_v18, %v166_v35  ;;  %244 = vst.msk [vmem:[%s691_s3 + $0x40] sm:$0xff] %vm235_vm2, %v558_v31  ;;  %v421_v38 = vpop.f32.mrb[2].mxu1  ;;  %v309_v9 = vmul.f32 %v558_v31, %v558_v31  ;;  %v275_v21 = vsel %vm235_vm2, %v558_v31, 0.0 }
  0xde   :  { %v319_v39 = vadd.f32 %v318_v32, %v317_v36  ;;  %239 = vst.msk [vmem:[%s691_s3 + $0x18] sm:$0xff] %vm235_vm2, %v172_v34  ;;  %v206_v40 = vpop.f32.mrb[3].mxu1  ;;  %v304_v41 = vmul.f32 %v172_v34, %v172_v34  ;;  %v584_v45 = vadd.f32 %v421_v38, %v540_v18  ;;  %v265_v49 = vsel %vm235_vm2, %v172_v34, 0.0 }
  0xdf   :  { %238 = vst.msk [vmem:[%s691_s3 + $0x10] sm:$0xff] %vm235_vm2, %v167_v37  ;;  %v263_v42 = vsel %vm235_vm2, %v167_v37, 0.0  ;;  %v303_v43 = vmul.f32 %v167_v37, %v167_v37  ;;  %v412_v44 = vpop.f32.mrb[4].mxu0  ;;  %v207_v61 = vadd.f32 %v540_v18, %v206_v40  ;;  %v332_v28 = vsel %vm235_vm2, %v309_v9, 0.0 }
  0xe0   :  { %v264_v46 = vadd.f32 %v263_v42, %v262_v33  ;;  %v182_v47 = vadd.f32 %v412_v44, %v540_v18  ;;  %v176_v48 = vpop.f32.mrb[5].mxu0  ;;  %247 = vst.msk [vmem:[%s691_s3 + $0x58] sm:$0xff] %vm235_vm2, %v584_v45  ;;  %v322_v57 = vsel %vm235_vm2, %v304_v41, 0.0  ;;  %v277_v33 = vsel %vm235_vm2, %v550_v26, 0.0 }
  0xe1   :  { %v320_v50 = vsel %vm235_vm2, %v303_v43, 0.0  ;;  %v177_v51 = vadd.f32 %v540_v18, %v176_v48  ;;  %v424_v52 = vpop.f32.mrb[4].mxu1  ;;  %246 = vst.msk [vmem:[%s691_s3 + $0x50] sm:$0xff] %vm235_vm2, %v207_v61  ;;  %v311_v29 = vmul.f32 %v207_v61, %v207_v61  ;;  %v279_v34 = vsel %vm235_vm2, %v207_v61, 0.0 }
  0xe2   :  { %v321_v53 = vadd.f32 %v320_v50, %v319_v39  ;;  %241 = vst.msk [vmem:[%s691_s3 + $0x28] sm:$0xff] %vm235_vm2, %v182_v47  ;;  %v306_v54 = vmul.f32 %v182_v47, %v182_v47  ;;  %v266_v55 = vadd.f32 %v265_v49, %v264_v46  ;;  %v216_v56 = vpop.f32.mrb[5].mxu1  ;;  %v269_v2 = vsel %vm235_vm2, %v182_v47, 0.0 }
  0xe3   :  { %240 = vst.msk [vmem:[%s691_s3 + $0x20] sm:$0xff] %vm235_vm2, %v177_v51  ;;  %v267_v58 = vsel %vm235_vm2, %v177_v51, 0.0  ;;  %v305_v59 = vmul.f32 %v177_v51, %v177_v51  ;;  %v415_v60 = vpop.f32.mrb[6].mxu0  ;;  %v222_v14 = vadd.f32 %v424_v52, %v540_v18  ;;  %v217_v17 = vadd.f32 %v540_v18, %v216_v56 }
  0xe4   :  { %v268_v62 = vadd.f32 %v267_v58, %v266_v55  ;;  %v323_v63 = vadd.f32 %v322_v57, %v321_v53  ;;  %v192_v0 = vadd.f32 %v415_v60, %v540_v18  ;;  %v186_v1 = vpop.f32.mrb[7].mxu0  ;;  %v326_v6 = vsel %vm235_vm2, %v306_v54, 0.0 }
  0xe5   :  { %v324_v3 = vsel %vm235_vm2, %v305_v59, 0.0  ;;  %v187_v4 = vadd.f32 %v540_v18, %v186_v1  ;;  %v427_v5 = vpop.f32.mrb[6].mxu1  ;;  %249 = vst.msk [vmem:[%s691_s3 + $0x68] sm:$0xff] %vm235_vm2, %v222_v14  ;;  %248 = vst.msk [vmem:[%s691_s3 + $0x60] sm:$0xff] %vm235_vm2, %v217_v17  ;;  %v334_v37 = vsel %vm235_vm2, %v310_v24, 0.0  ;;  %v312_v38 = vmul.f32 %v584_v45, %v584_v45 }
  0xe6   :  { %v325_v7 = vadd.f32 %v324_v3, %v323_v63  ;;  %243 = vst.msk [vmem:[%s691_s3 + $0x38] sm:$0xff] %vm235_vm2, %v192_v0  ;;  %v270_v8 = vadd.f32 %v269_v2, %v268_v62  ;;  %v226_v10 = vpop.f32.mrb[7].mxu1  ;;  %v308_v11 = vmul.f32 %v192_v0, %v192_v0  ;;  %v273_v19 = vsel %vm235_vm2, %v192_v0, 0.0 }
  0xe7   :  { %242 = vst.msk [vmem:[%s691_s3 + $0x30] sm:$0xff] %vm235_vm2, %v187_v4  ;;  %v271_v12 = vsel %vm235_vm2, %v187_v4, 0.0  ;;  %v307_v13 = vmul.f32 %v187_v4, %v187_v4  ;;  %v232_v22 = vadd.f32 %v427_v5, %v540_v18  ;;  %v227_v30 = vadd.f32 %v540_v18, %v226_v10  ;;  %v259_v10 = vld [vmem:[%s688_s4] sm:$0x1] }
  0xe8   :  { %v272_v15 = vadd.f32 %v271_v12, %v270_v8  ;;  %v327_v16 = vadd.f32 %v326_v6, %v325_v7  ;;  %v330_v27 = vsel %vm235_vm2, %v308_v11, 0.0  ;;  %v336_v18 = vsel %vm235_vm2, %v311_v29, 0.0 }
  0xe9   :  { %v328_v20 = vsel %vm235_vm2, %v307_v13, 0.0  ;;  %251 = vst.msk [vmem:[%s691_s3 + $0x78] sm:$0xff] %vm235_vm2, %v232_v22  ;;  %250 = vst.msk [vmem:[%s691_s3 + $0x70] sm:$0xff] %vm235_vm2, %v227_v30  ;;  %v313_v39 = vmul.f32 %v217_v17, %v217_v17  ;;  %v281_v26 = vsel %vm235_vm2, %v584_v45, 0.0  ;;  %v283_v42 = vsel %vm235_vm2, %v217_v17, 0.0 }
  0xea   :  { %v329_v23 = vadd.f32 %v328_v20, %v327_v16  ;;  %v274_v25 = vadd.f32 %v273_v19, %v272_v15  ;;  %v338_v46 = vsel %vm235_vm2, %v312_v38, 0.0  ;;  %v314_v47 = vmul.f32 %v222_v14, %v222_v14  ;;  %v300_v13 = vld [vmem:[%s689_s5] sm:$0x1] }
  0xeb   :  { %v340_v48 = vsel %vm235_vm2, %v313_v39, 0.0  ;;  %v315_v49 = vmul.f32 %v227_v30, %v227_v30  ;;  %v285_v52 = vsel %vm235_vm2, %v222_v14, 0.0  ;;  %v287_v53 = vsel %vm235_vm2, %v227_v30, 0.0 }
  0xec   :  { %v276_v31 = vadd.f32 %v275_v21, %v274_v25  ;;  %v331_v32 = vadd.f32 %v330_v27, %v329_v23  ;;  %v342_v45 = vsel %vm235_vm2, %v314_v47, 0.0  ;;  %v316_v56 = vmul.f32 %v232_v22, %v232_v22 }
  0xed   :  { %v344_v57 = vsel %vm235_vm2, %v315_v49, 0.0  ;;  %v289_v60 = vsel %vm235_vm2, %v232_v22, 0.0 }
  0xee   :  { %v333_v35 = vadd.f32 %v332_v28, %v331_v32  ;;  %v278_v36 = vadd.f32 %v277_v33, %v276_v31  ;;  %v346_v63 = vsel %vm235_vm2, %v316_v56, 0.0 }
  0xf0   :  { %v280_v40 = vadd.f32 %v279_v34, %v278_v36  ;;  %v335_v41 = vadd.f32 %v334_v37, %v333_v35 }
  0xf2   :  { %v337_v43 = vadd.f32 %v336_v18, %v335_v41  ;;  %v282_v44 = vadd.f32 %v281_v26, %v280_v40 }
  0xf4   :  { %v284_v50 = vadd.f32 %v283_v42, %v282_v44  ;;  %v339_v51 = vadd.f32 %v338_v46, %v337_v43 }
  0xf6   :  { %v341_v54 = vadd.f32 %v340_v48, %v339_v51  ;;  %v286_v55 = vadd.f32 %v285_v52, %v284_v50 }
  0xf8   :  { %v288_v58 = vadd.f32 %v287_v53, %v286_v55  ;;  %v343_v59 = vadd.f32 %v342_v45, %v341_v54 }
  0xfa   :  { %v290_v61 = vadd.f32 %v289_v60, %v288_v58  ;;  %v345_v62 = vadd.f32 %v344_v57, %v343_v59 }
  0xfc   :  { %v291_v0 = vrot.slane %v290_v61, 4  ;;  %v347_v1 = vadd.f32 %v346_v63, %v345_v62 }
  0xfe   :  { %v292_v2 = vadd.f32 %v291_v0, %v290_v61  ;;  %v348_v3 = vrot.slane %v347_v1, 4 }
 0x100   :  { %v293_v4 = vrot.slane %v292_v2, 2  ;;  %v349_v5 = vadd.f32 %v348_v3, %v347_v1 }
 0x102   :  { %v294_v6 = vadd.f32 %v293_v4, %v292_v2  ;;  %v350_v7 = vrot.slane %v349_v5, 2 }
 0x104   :  { %v295_v8 = vrot.slane %v294_v6, 1  ;;  %v351_v9 = vadd.f32 %v350_v7, %v349_v5 }
 0x106   :  { %v296_v11 = vadd.f32 %v295_v8, %v294_v6  ;;  %v352_v12 = vrot.slane %v351_v9, 1 }
 0x108   :  { %v297_v14 = vadd.f32 %v296_v11, %v259_v10  ;;  %v353_v15 = vadd.f32 %v352_v12, %v351_v9 }
 0x10a   :  { %299 = vst.msk [vmem:[%s688_s4] sm:$0x1] %vm256_vm1, %v297_v14  ;;  %v354_v16 = vadd.f32 %v353_v15, %v300_v13 }
 0x10c   :  { %355 = vst.msk [vmem:[%s689_s5] sm:$0x1] %vm256_vm1, %v354_v16 }

// kernel: combine_layers_forward.5
= control target key start
LH: loop header
LB: loop body
LE: loop exit
PB: predicated region body
PF: predicated region fallthrough
CT: control target
= control target key end

     0   :  { %s80_s0 = inlined_call_operand.vmem [shape: f32[16,128], index: 0, kind: input, shape index: {}]   ;;  %s81_s1 = inlined_call_operand.vmem [shape: f32[1,128], index: 1, kind: input, shape index: {}]   ;;  %s82_s2 = inlined_call_operand.vmem [shape: f32[1,128], index: 2, kind: input, shape index: {}]   ;;  %s83_s3 = inlined_call_operand.vmem [shape: f32[16,128], index: 3, kind: output, shape index: {}]  }
   0x1   :  { %v14_v0 = vld [vmem:[%s80_s0] sm:$0xff]  ;;  %v15_v4 = vld [vmem:[%s80_s0 + $0x8] sm:$0xff] }
   0x2   :  { %v40_v1 = vld [vmem:[%s81_s1] ss:$0 sm:$0xff] }
   0x3   :  { %v41_v2 = vld [vmem:[%s82_s2] ss:$0 sm:$0xff]  ;;  %v23_v3 = vmul.f32 %v40_v1, %v14_v0  ;;  %v24_v5 = vmul.f32 %v40_v1, %v15_v4 }
   0x5   :  { %v32_v6 = vadd.f32 %v41_v2, %v23_v3  ;;  %v33_v7 = vadd.f32 %v41_v2, %v24_v5 }
   0x7   :  { %34 = vst [vmem:[%s83_s3] sm:$0xff] %v32_v6  ;;  %35 = vst [vmem:[%s83_s3 + $0x8] sm:$0xff] %v33_v7 }

// kernel: combine_layers_forward.4
= control target key start
LH: loop header
LB: loop body
LE: loop exit
PB: predicated region body
PF: predicated region fallthrough
CT: control target
= control target key end

     0   :  { %vm164_vm0 = vcmask 1043456   ;;  %vm115_vm1 = vcmask 31744   ;;  %vm317_vm2 = vcmask 24576   ;;  %s2098_s23 = smov 8   ;;  %vm1435_vm3 = vcmask 64512   ;;  %s3240_s4 = inlined_call_operand.vmem [shape: f32[4,4], index: 4, kind: input, shape index: {}]   ;;  %s3241_s0 = inlined_call_operand.vmem [shape: f32[128,4], index: 0, kind: input, shape index: {}]   ;;  %s3242_s2 = inlined_call_operand.vmem [shape: f32[1,4], index: 2, kind: input, shape index: {}]   ;;  %s3243_s3 = inlined_call_operand.vmem [shape: f32[1,4], index: 3, kind: input, shape index: {}]   ;;  %s3244_s5 = inlined_call_operand.vmem [shape: f32[4,4], index: 5, kind: input, shape index: {}]   ;;  %s3245_s1 = inlined_call_operand.vmem [shape: f32[4,128,4], index: 1, kind: input, shape index: {}]   ;;  %s3246_s8 = inlined_call_operand.vmem [shape: f32[1,4], index: 8, kind: output, shape index: {1}]   ;;  %s3247_s9 = inlined_call_operand.vmem [shape: f32[1,4], index: 9, kind: output, shape index: {2}]   ;;  %s3248_s6 = inlined_call_operand.vmem [shape: f32[1,4], index: 6, kind: input, shape index: {}]   ;;  %s3249_s7 = inlined_call_operand.vmem [shape: f32[128,16], index: 7, kind: output, shape index: {0}]  }
   0x1   :  { %v107_v0 = vld [vmem:[%s3240_s4] sm:$0xf]  ;;  %v30_v8 = vld [vmem:[%s3241_s0 + $0x8] sm:$0xff]  ;;  %v31_v10 = vld [vmem:[%s3241_s0 + $0x10] sm:$0xff]  ;;  %vm1452_vm4 = vcmask 97280   ;;  %vm1469_vm5 = vcmask 130048  }
   0x2   :  { %v29_v1 = vld [vmem:[%s3241_s0] sm:$0xff]  ;;  %1960 = vmatprep.subr.msk.mxu0 %vm164_vm0, %v107_v0  ;;  %2090 = vmatprep.subr.msk.mxu1 %vm164_vm0, %v107_v0  ;;  %v38_v9 = vld [vmem:[%s3241_s0 + $0x48] sm:$0xff]  ;;  %v39_v14 = vld [vmem:[%s3241_s0 + $0x50] sm:$0xff] }
   0x3   :  { %v2159_v2 = vld [vmem:[%s3242_s2] ss:$0 sm:$0xff]  ;;  %1961 = vmatpush3.msk.msra.mxu0 %vm164_vm0, %v107_v0  ;;  %2091 = vmatpush3.msk.msra.mxu1 %vm164_vm0, %v107_v0  ;;  %v32_v15 = vld [vmem:[%s3241_s0 + $0x18] sm:$0xff]  ;;  %v34_v31 = vld [vmem:[%s3241_s0 + $0x28] sm:$0xff] }
   0x4   :  { %v52_v3 = vmul.f32 %v2159_v2, %v29_v1  ;;  %v2167_v4 = vld [vmem:[%s3243_s3] ss:$0 sm:$0xff]  ;;  %v53_v12 = vmul.f32 %v2159_v2, %v30_v8  ;;  %v61_v13 = vmul.f32 %v2159_v2, %v38_v9  ;;  %v40_v16 = vld [vmem:[%s3241_s0 + $0x58] sm:$0xff]  ;;  %v54_v18 = vmul.f32 %v2159_v2, %v31_v10  ;;  %v42_v32 = vld [vmem:[%s3241_s0 + $0x68] sm:$0xff] }
   0x5   :  { %v37_v5 = vld [vmem:[%s3241_s0 + $0x40] sm:$0xff]  ;;  %v62_v19 = vmul.f32 %v2159_v2, %v39_v14  ;;  %v55_v20 = vmul.f32 %v2159_v2, %v32_v15  ;;  %v63_v25 = vmul.f32 %v2159_v2, %v40_v16  ;;  %v35_v37 = vld [vmem:[%s3241_s0 + $0x30] sm:$0xff]  ;;  %v36_v43 = vld [vmem:[%s3241_s0 + $0x38] sm:$0xff]  ;;  %v57_v46 = vmul.f32 %v2159_v2, %v34_v31 }
   0x6   :  { %v2175_v6 = vld [vmem:[%s3244_s5] sm:$0xf]  ;;  %v60_v7 = vmul.f32 %v2159_v2, %v37_v5  ;;  %v75_v11 = vadd.f32 %v2167_v4, %v52_v3  ;;  %v76_v23 = vadd.f32 %v2167_v4, %v53_v12  ;;  %v84_v24 = vadd.f32 %v2167_v4, %v61_v13  ;;  %v43_v38 = vld [vmem:[%s3241_s0 + $0x70] sm:$0xff]  ;;  %v44_v48 = vld [vmem:[%s3241_s0 + $0x78] sm:$0xff]  ;;  %s2099_s5 = smov 12  }
   0x7   :  { %2012 = vmatprep.subr.msk.mxu0 %vm164_vm0, %v2175_v6  ;;  %1986 = vmatprep.subr.msk.mxu1 %vm164_vm0, %v2175_v6  ;;  %v33_v21 = vld [vmem:[%s3241_s0 + $0x20] sm:$0xff]  ;;  %v77_v28 = vadd.f32 %v2167_v4, %v54_v18  ;;  %v85_v29 = vadd.f32 %v2167_v4, %v62_v19  ;;  %v78_v30 = vadd.f32 %v2167_v4, %v55_v20  ;;  %v1777_v8 = vld [vmem:[%s3245_s1 + $0x88] sm:$0xff]  ;;  %v322_v9 = vld [vmem:[%s3245_s1 + $0x10] sm:$0xff] }
   0x8   :  { %v83_v17 = vadd.f32 %v2167_v4, %v60_v7  ;;  %v91_v22 = vmax.f32 %v75_v11, 0.0  ;;  %v41_v26 = vld [vmem:[%s3241_s0 + $0x60] sm:$0xff]  ;;  %v92_v33 = vmax.f32 %v76_v23, 0.0  ;;  %v100_v34 = vmax.f32 %v84_v24, 0.0  ;;  %v1778_v10 = vld [vmem:[%s3245_s1 + $0x90] sm:$0xff]  ;;  %v323_v11 = vld [vmem:[%s3245_s1 + $0x18] sm:$0xff] }
   0x9   :  { %v86_v35 = vadd.f32 %v2167_v4, %v63_v25  ;;  %v56_v36 = vmul.f32 %v2159_v2, %v33_v21  ;;  %v93_v39 = vmax.f32 %v77_v28, 0.0  ;;  %v101_v40 = vmax.f32 %v85_v29, 0.0  ;;  %v320_v5 = vld [vmem:[%s3245_s1] sm:$0xff]  ;;  %v1779_v12 = vld [vmem:[%s3245_s1 + $0x98] sm:$0xff]  ;;  %v325_v15 = vld [vmem:[%s3245_s1 + $0x28] sm:$0xff] }
   0xa   :  { %v99_v27 = vmax.f32 %v83_v17, 0.0  ;;  %1962 = vmatprep.mubr.msk.f32.mxu0 %vm115_vm1, %v91_v22  ;;  %v94_v41 = vmax.f32 %v78_v30, 0.0  ;;  %v64_v42 = vmul.f32 %v2159_v2, %v41_v26  ;;  %v65_v47 = vmul.f32 %v2159_v2, %v42_v32  ;;  %v1776_v7 = vld [vmem:[%s3245_s1 + $0x80] sm:$0xff]  ;;  %v1781_v16 = vld [vmem:[%s3245_s1 + $0xa8] sm:$0xff]  ;;  %v1782_v17 = vld [vmem:[%s3245_s1 + $0xb0] sm:$0xff] }
   0xb   :  { %1963 = vmatmul.mubr.msk.f32.vlgmr.msra.gmra.mrb[0].mxu0 %vm115_vm1, %v92_v33  ;;  %v102_v44 = vmax.f32 %v86_v35, 0.0  ;;  %v79_v45 = vadd.f32 %v2167_v4, %v56_v36  ;;  %v58_v50 = vmul.f32 %v2159_v2, %v35_v37  ;;  %v66_v51 = vmul.f32 %v2159_v2, %v43_v38  ;;  %v324_v13 = vld [vmem:[%s3245_s1 + $0x20] sm:$0xff]  ;;  %v327_v18 = vld [vmem:[%s3245_s1 + $0x38] sm:$0xff]  ;;  %v329_v22 = vld [vmem:[%s3245_s1 + $0x48] sm:$0xff] }
   0xc   :  { %1974 = vmatprep.mubr.msk.f32.mxu1 %vm115_vm1, %v99_v27  ;;  %2013 = vmatpush3.msk.msra.mxu0 %vm164_vm0, %v2175_v6  ;;  %v87_v49 = vadd.f32 %v2167_v4, %v64_v42  ;;  %v80_v53 = vadd.f32 %v2167_v4, %v57_v46  ;;  %v88_v54 = vadd.f32 %v2167_v4, %v65_v47  ;;  %v1780_v14 = vld [vmem:[%s3245_s1 + $0xa0] sm:$0xff]  ;;  %v1783_v19 = vld [vmem:[%s3245_s1 + $0xb8] sm:$0xff]  ;;  %v1785_v23 = vld [vmem:[%s3245_s1 + $0xc8] sm:$0xff] }
   0xd   :  { %1975 = vmatmul.mubr.msk.f32.vlgmr.msra.gmra.mrb[0].mxu1 %vm115_vm1, %v100_v34  ;;  %1965 = vmatprep.mubr.msk.f32.mxu0 %vm115_vm1, %v93_v39  ;;  %v95_v52 = vmax.f32 %v79_v45, 0.0  ;;  %v59_v55 = vmul.f32 %v2159_v2, %v36_v43  ;;  %v81_v57 = vadd.f32 %v2167_v4, %v58_v50  ;;  %v89_v58 = vadd.f32 %v2167_v4, %v66_v51  ;;  %v328_v20 = vld [vmem:[%s3245_s1 + $0x40] sm:$0xff]  ;;  %v330_v24 = vld [vmem:[%s3245_s1 + $0x50] sm:$0xff]  ;;  %v331_v26 = vld [vmem:[%s3245_s1 + $0x58] sm:$0xff] }
   0xe   :  { %1977 = vmatprep.mubr.msk.f32.mxu1 %vm115_vm1, %v101_v40  ;;  %1987 = vmatpush3.msk.msra.mxu1 %vm164_vm0, %v2175_v6  ;;  %v103_v56 = vmax.f32 %v87_v49, 0.0  ;;  %v67_v59 = vmul.f32 %v2159_v2, %v44_v48  ;;  %v96_v60 = vmax.f32 %v80_v53, 0.0  ;;  %v104_v61 = vmax.f32 %v88_v54, 0.0  ;;  %v1784_v21 = vld [vmem:[%s3245_s1 + $0xc0] sm:$0xff]  ;;  %v1786_v25 = vld [vmem:[%s3245_s1 + $0xd0] sm:$0xff]  ;;  %v1787_v27 = vld [vmem:[%s3245_s1 + $0xd8] sm:$0xff] }
   0xf   :  { %2038 = vmatprep.subr.msk.mxu1 %vm164_vm0, %v2175_v6  ;;  %2064 = vmatprep.subr.msk.mxu0 %vm164_vm0, %v2175_v6  ;;  %v82_v62 = vadd.f32 %v2167_v4, %v59_v55  ;;  %v97_v63 = vmax.f32 %v81_v57, 0.0  ;;  %v105_v0 = vmax.f32 %v89_v58, 0.0  ;;  %v332_v28 = vld [vmem:[%s3245_s1 + $0x60] sm:$0xff]  ;;  %v333_v30 = vld [vmem:[%s3245_s1 + $0x68] sm:$0xff]  ;;  %v334_v32 = vld [vmem:[%s3245_s1 + $0x70] sm:$0xff] }
  0x10   :  { %1966 = vmatmul.mubr.msk.f32.gmra.mrb[2].mxu0 %vm115_vm1, %v94_v41  ;;  %v90_v1 = vadd.f32 %v2167_v4, %v67_v59  ;;  %v321_v4 = vld [vmem:[%s3245_s1 + $0x8] sm:$0xff]  ;;  %v1788_v29 = vld [vmem:[%s3245_s1 + $0xe0] sm:$0xff]  ;;  %v1790_v33 = vld [vmem:[%s3245_s1 + $0xf0] sm:$0xff] }
  0x11   :  { %1978 = vmatmul.mubr.msk.f32.gmra.mrb[2].mxu1 %vm115_vm1, %v102_v44  ;;  %1968 = vmatprep.mubr.msk.f32.mxu0 %vm115_vm1, %v95_v52  ;;  %v98_v2 = vmax.f32 %v82_v62, 0.0  ;;  %v1789_v31 = vld [vmem:[%s3245_s1 + $0xe8] sm:$0xff]  ;;  %v335_v34 = vld [vmem:[%s3245_s1 + $0x78] sm:$0xff]  ;;  %v1809_v36 = vld [vmem:[%s3245_s1 + $0x100] sm:$0xff] }
  0x12   :  { %1980 = vmatprep.mubr.msk.f32.mxu1 %vm115_vm1, %v103_v56  ;;  %v106_v3 = vmax.f32 %v90_v1, 0.0  ;;  %v1791_v35 = vld [vmem:[%s3245_s1 + $0xf8] sm:$0xff]  ;;  %v1842_v37 = vld [vmem:[%s3245_s1 + $0x180] sm:$0xff]  ;;  %v1810_v38 = vld [vmem:[%s3245_s1 + $0x108] sm:$0xff] }
  0x13   :  { %v1843_v39 = vld [vmem:[%s3245_s1 + $0x188] sm:$0xff]  ;;  %v1811_v40 = vld [vmem:[%s3245_s1 + $0x110] sm:$0xff]  ;;  %v1812_v42 = vld [vmem:[%s3245_s1 + $0x118] sm:$0xff] }
  0x14   :  { %1969 = vmatmul.mubr.msk.f32.gmra.mrb[4].mxu0 %vm115_vm1, %v96_v60  ;;  %v1844_v41 = vld [vmem:[%s3245_s1 + $0x190] sm:$0xff]  ;;  %v1845_v43 = vld [vmem:[%s3245_s1 + $0x198] sm:$0xff]  ;;  %v1813_v44 = vld [vmem:[%s3245_s1 + $0x120] sm:$0xff] }
  0x15   :  { %1981 = vmatmul.mubr.msk.f32.gmra.mrb[4].mxu1 %vm115_vm1, %v104_v61  ;;  %1971 = vmatprep.mubr.msk.f32.mxu0 %vm115_vm1, %v97_v63  ;;  %v1846_v45 = vld [vmem:[%s3245_s1 + $0x1a0] sm:$0xff]  ;;  %v1814_v46 = vld [vmem:[%s3245_s1 + $0x128] sm:$0xff]  ;;  %v1815_v48 = vld [vmem:[%s3245_s1 + $0x130] sm:$0xff] }
  0x16   :  { %1983 = vmatprep.mubr.msk.f32.mxu1 %vm115_vm1, %v105_v0  ;;  %v1847_v47 = vld [vmem:[%s3245_s1 + $0x1a8] sm:$0xff]  ;;  %v1848_v49 = vld [vmem:[%s3245_s1 + $0x1b0] sm:$0xff]  ;;  %v1816_v50 = vld [vmem:[%s3245_s1 + $0x138] sm:$0xff] }
  0x17   :  { %v1849_v51 = vld [vmem:[%s3245_s1 + $0x1b8] sm:$0xff]  ;;  %v1817_v52 = vld [vmem:[%s3245_s1 + $0x140] sm:$0xff]  ;;  %v1818_v54 = vld [vmem:[%s3245_s1 + $0x148] sm:$0xff] }
  0x18   :  { %1972 = vmatmul.mubr.msk.f32.gmra.mrb[6].mxu0 %vm115_vm1, %v98_v2  ;;  %v1850_v53 = vld [vmem:[%s3245_s1 + $0x1c0] sm:$0xff]  ;;  %v1851_v55 = vld [vmem:[%s3245_s1 + $0x1c8] sm:$0xff]  ;;  %v1819_v56 = vld [vmem:[%s3245_s1 + $0x150] sm:$0xff] }
  0x19   :  { %1984 = vmatmul.mubr.msk.f32.gmra.mrb[6].mxu1 %vm115_vm1, %v106_v3  ;;  %2014 = vmatprep.mubr.msk.f32.mxu0 %vm115_vm1, %v1776_v7  ;;  %v1852_v57 = vld [vmem:[%s3245_s1 + $0x1d0] sm:$0xff]  ;;  %v1820_v58 = vld [vmem:[%s3245_s1 + $0x158] sm:$0xff]  ;;  %v1821_v60 = vld [vmem:[%s3245_s1 + $0x160] sm:$0xff] }
  0x1a   :  { %1988 = vmatprep.mubr.msk.f32.mxu1 %vm115_vm1, %v320_v5  ;;  %v1853_v59 = vld [vmem:[%s3245_s1 + $0x1d8] sm:$0xff]  ;;  %v1854_v61 = vld [vmem:[%s3245_s1 + $0x1e0] sm:$0xff]  ;;  %v1822_v62 = vld [vmem:[%s3245_s1 + $0x168] sm:$0xff]  ;;  %v2096_v5 = vmov 0.0  }
  0x1b   :  { %v1855_v63 = vld [vmem:[%s3245_s1 + $0x1e8] sm:$0xff]  ;;  %v1823_v0 = vld [vmem:[%s3245_s1 + $0x170] sm:$0xff]  ;;  %v1824_v2 = vld [vmem:[%s3245_s1 + $0x178] sm:$0xff]  ;;  %318 = vst.msk [vmem:[%s3246_s8] sm:$0x1] %vm317_vm2, %v2096_v5 }
  0x1c   :  { %2015 = vmatmul.mubr.msk.f32.vlgmr.msra.gmra.mrb[8].mxu0 %vm115_vm1, %v1777_v8  ;;  %v1856_v1 = vld [vmem:[%s3245_s1 + $0x1f0] sm:$0xff]  ;;  %v1857_v3 = vld [vmem:[%s3245_s1 + $0x1f8] sm:$0xff]  ;;  %319 = vst.msk [vmem:[%s3247_s9] sm:$0x1] %vm317_vm2, %v2096_v5 }
  0x1d   :  { %1989 = vmatmul.mubr.msk.f32.vlgmr.msra.gmra.mrb[8].mxu1 %vm115_vm1, %v321_v4  ;;  %2017 = vmatprep.mubr.msk.f32.mxu0 %vm115_vm1, %v1778_v10 }
  0x1e   :  { %1991 = vmatprep.mubr.msk.f32.mxu1 %vm115_vm1, %v322_v9  ;;  %2039 = vmatpush3.msk.msra.mxu1 %vm164_vm0, %v2175_v6 }
  0x1f   :  { %2065 = vmatpush3.msk.msra.mxu0 %vm164_vm0, %v2175_v6  ;;  %v326_v6 = vld [vmem:[%s3245_s1 + $0x30] sm:$0xff] }
  0x20   :  { %2018 = vmatmul.mubr.msk.f32.gmra.mrb[10].mxu0 %vm115_vm1, %v1779_v12 }
  0x21   :  { %1992 = vmatmul.mubr.msk.f32.gmra.mrb[10].mxu1 %vm115_vm1, %v323_v11  ;;  %2020 = vmatprep.mubr.msk.f32.mxu0 %vm115_vm1, %v1780_v14 }
  0x22   :  { %1994 = vmatprep.mubr.msk.f32.mxu1 %vm115_vm1, %v324_v13 }
  0x24   :  { %2021 = vmatmul.mubr.msk.f32.gmra.mrb[12].mxu0 %vm115_vm1, %v1781_v16 }
  0x25   :  { %1995 = vmatmul.mubr.msk.f32.gmra.mrb[12].mxu1 %vm115_vm1, %v325_v15  ;;  %2023 = vmatprep.mubr.msk.f32.mxu0 %vm115_vm1, %v1782_v17  ;;  %v2559_v17 = vld [vmem:[%s3248_s6] ss:$0 sm:$0xff]  ;;  %s2097_s6 = smov 4  }
  0x26   :  { %1997 = vmatprep.mubr.msk.f32.mxu1 %vm115_vm1, %v326_v6 }
  0x28   :  { %2024 = vmatmul.mubr.msk.f32.gmra.mrb[14].mxu0 %vm115_vm1, %v1783_v19 }
  0x29   :  { %1998 = vmatmul.mubr.msk.f32.gmra.mrb[14].mxu1 %vm115_vm1, %v327_v18  ;;  %2026 = vmatprep.mubr.msk.f32.mxu0 %vm115_vm1, %v1784_v21 }
  0x2a   :  { %2000 = vmatprep.mubr.msk.f32.mxu1 %vm115_vm1, %v328_v20 }
  0x2c   :  { %2027 = vmatmul.mubr.msk.f32.gmra.mrb[16].mxu0 %vm115_vm1, %v1785_v23 }
  0x2d   :  { %2001 = vmatmul.mubr.msk.f32.gmra.mrb[16].mxu1 %vm115_vm1, %v329_v22  ;;  %2029 = vmatprep.mubr.msk.f32.mxu0 %vm115_vm1, %v1786_v25 }
  0x2e   :  { %2003 = vmatprep.mubr.msk.f32.mxu1 %vm115_vm1, %v330_v24 }
  0x30   :  { %2030 = vmatmul.mubr.msk.f32.gmra.mrb[18].mxu0 %vm115_vm1, %v1787_v27 }
  0x31   :  { %2004 = vmatmul.mubr.msk.f32.gmra.mrb[18].mxu1 %vm115_vm1, %v331_v26  ;;  %2032 = vmatprep.mubr.msk.f32.mxu0 %vm115_vm1, %v1788_v29 }
  0x32   :  { %2006 = vmatprep.mubr.msk.f32.mxu1 %vm115_vm1, %v332_v28 }
  0x34   :  { %2033 = vmatmul.mubr.msk.f32.gmra.mrb[20].mxu0 %vm115_vm1, %v1789_v31 }
  0x35   :  { %2007 = vmatmul.mubr.msk.f32.gmra.mrb[20].mxu1 %vm115_vm1, %v333_v30  ;;  %2035 = vmatprep.mubr.msk.f32.mxu0 %vm115_vm1, %v1790_v33 }
  0x36   :  { %2009 = vmatprep.mubr.msk.f32.mxu1 %vm115_vm1, %v334_v32 }
  0x38   :  { %2036 = vmatmul.mubr.msk.f32.gmra.mrb[22].mxu0 %vm115_vm1, %v1791_v35 }
  0x39   :  { %2010 = vmatmul.mubr.msk.f32.gmra.mrb[22].mxu1 %vm115_vm1, %v335_v34  ;;  %2066 = vmatprep.mubr.msk.f32.mxu0 %vm115_vm1, %v1842_v37 }
  0x3a   :  { %2040 = vmatprep.mubr.msk.f32.mxu1 %vm115_vm1, %v1809_v36 }
  0x3c   :  { %2067 = vmatmul.mubr.msk.f32.vlgmr.msra.gmra.mrb[24].mxu0 %vm115_vm1, %v1843_v39 }
  0x3d   :  { %2041 = vmatmul.mubr.msk.f32.vlgmr.msra.gmra.mrb[24].mxu1 %vm115_vm1, %v1810_v38  ;;  %2069 = vmatprep.mubr.msk.f32.mxu0 %vm115_vm1, %v1844_v41 }
  0x3e   :  { %2043 = vmatprep.mubr.msk.f32.mxu1 %vm115_vm1, %v1811_v40 }
  0x40   :  { %2070 = vmatmul.mubr.msk.f32.gmra.mrb[26].mxu0 %vm115_vm1, %v1845_v43 }
  0x41   :  { %2044 = vmatmul.mubr.msk.f32.gmra.mrb[26].mxu1 %vm115_vm1, %v1812_v42  ;;  %2072 = vmatprep.mubr.msk.f32.mxu0 %vm115_vm1, %v1846_v45 }
  0x42   :  { %2046 = vmatprep.mubr.msk.f32.mxu1 %vm115_vm1, %v1813_v44 }
  0x44   :  { %2073 = vmatmul.mubr.msk.f32.gmra.mrb[28].mxu0 %vm115_vm1, %v1847_v47 }
  0x45   :  { %2047 = vmatmul.mubr.msk.f32.gmra.mrb[28].mxu1 %vm115_vm1, %v1814_v46  ;;  %2075 = vmatprep.mubr.msk.f32.mxu0 %vm115_vm1, %v1848_v49 }
  0x46   :  { %2049 = vmatprep.mubr.msk.f32.mxu1 %vm115_vm1, %v1815_v48 }
  0x48   :  { %2076 = vmatmul.mubr.msk.f32.gmra.mrb[30].mxu0 %vm115_vm1, %v1849_v51 }
  0x49   :  { %2050 = vmatmul.mubr.msk.f32.gmra.mrb[30].mxu1 %vm115_vm1, %v1816_v50  ;;  %2078 = vmatprep.mubr.msk.f32.mxu0 %vm115_vm1, %v1850_v53 }
  0x4a   :  { %2052 = vmatprep.mubr.msk.f32.mxu1 %vm115_vm1, %v1817_v52 }
  0x4c   :  { %2079 = vmatmul.mubr.msk.f32.gmra.mrb[32].mxu0 %vm115_vm1, %v1851_v55 }
  0x4d   :  { %2053 = vmatmul.mubr.msk.f32.gmra.mrb[32].mxu1 %vm115_vm1, %v1818_v54  ;;  %2081 = vmatprep.mubr.msk.f32.mxu0 %vm115_vm1, %v1852_v57 }
  0x4e   :  { %2055 = vmatprep.mubr.msk.f32.mxu1 %vm115_vm1, %v1819_v56 }
  0x50   :  { %2082 = vmatmul.mubr.msk.f32.gmra.mrb[34].mxu0 %vm115_vm1, %v1853_v59 }
  0x51   :  { %2056 = vmatmul.mubr.msk.f32.gmra.mrb[34].mxu1 %vm115_vm1, %v1820_v58  ;;  %2084 = vmatprep.mubr.msk.f32.mxu0 %vm115_vm1, %v1854_v61 }
  0x52   :  { %2058 = vmatprep.mubr.msk.f32.mxu1 %vm115_vm1, %v1821_v60 }
  0x54   :  { %2085 = vmatmul.mubr.msk.f32.gmra.mrb[36].mxu0 %vm115_vm1, %v1855_v63 }
  0x55   :  { %2059 = vmatmul.mubr.msk.f32.gmra.mrb[36].mxu1 %vm115_vm1, %v1822_v62  ;;  %2087 = vmatprep.mubr.msk.f32.mxu0 %vm115_vm1, %v1856_v1 }
  0x56   :  { %2061 = vmatprep.mubr.msk.f32.mxu1 %vm115_vm1, %v1823_v0 }
  0x58   :  { %2088 = vmatmul.mubr.msk.f32.gmra.mrb[38].mxu0 %vm115_vm1, %v1857_v3 }
  0x59   :  { %2062 = vmatmul.mubr.msk.f32.gmra.mrb[38].mxu1 %vm115_vm1, %v1824_v2 }
  0xde   :  { %v1964_v7 = vpop.f32.mrb[0].mxu0 }
  0xdf   :  { %v234_v8 = vpop.f32.mrb[1].mxu0  ;;  %v2562_v22 = vadd.f32 %v1964_v7, %v2559_v17 }
  0xe0   :  { %v1976_v4 = vpop.f32.mrb[0].mxu1  ;;  %v2565_v23 = vadd.f32 %v2559_v17, %v234_v8 }
  0xe1   :  { %v2548_v9 = vpop.f32.mrb[1].mxu1  ;;  %v2618_v53 = vadd.f32 %v1976_v4, %v2559_v17 }
  0xe2   :  { %v2639_v3 = vadd.f32 %v2559_v17, %v2548_v9 }
  0xe3   :  { %v1967_v10 = vpop.f32.mrb[2].mxu0 }
  0xe4   :  { %v2550_v11 = vpop.f32.mrb[2].mxu1  ;;  %v244_v12 = vpop.f32.mrb[3].mxu0  ;;  %v2576_v32 = vadd.f32 %v1967_v10, %v2559_v17 }
  0xe5   :  { %v2552_v13 = vpop.f32.mrb[3].mxu1  ;;  %v2580_v33 = vadd.f32 %v2559_v17, %v244_v12  ;;  %v2643_v5 = vadd.f32 %v2550_v11, %v2559_v17 }
  0xe6   :  { %v2647_v7 = vadd.f32 %v2559_v17, %v2552_v13 }
  0xe7   :  { %v1970_v14 = vpop.f32.mrb[4].mxu0 }
  0xe8   :  { %v2554_v15 = vpop.f32.mrb[4].mxu1  ;;  %v254_v16 = vpop.f32.mrb[5].mxu0  ;;  %v2593_v42 = vadd.f32 %v1970_v14, %v2559_v17 }
  0xe9   :  { %v294_v6 = vpop.f32.mrb[5].mxu1  ;;  %v2598_v43 = vadd.f32 %v2559_v17, %v254_v16  ;;  %v2651_v4 = vadd.f32 %v2554_v15, %v2559_v17 }
  0xea   :  { %v2656_v8 = vadd.f32 %v2559_v17, %v294_v6 }
  0xeb   :  { %v1973_v18 = vpop.f32.mrb[6].mxu0 }
  0xec   :  { %v1985_v19 = vpop.f32.mrb[6].mxu1  ;;  %v264_v20 = vpop.f32.mrb[7].mxu0  ;;  %v2613_v52 = vadd.f32 %v1973_v18, %v2559_v17  ;;  %3281 = vst [vmem:[#allocation10_spill] sm:$0xff] %v2656_v8 }
  0xed   :  { %v304_v21 = vpop.f32.mrb[7].mxu1  ;;  %v2621_v54 = vadd.f32 %v2559_v17, %v264_v20  ;;  %v2659_v9 = vadd.f32 %v1985_v19, %v2559_v17 }
  0xee   :  { %v2662_v10 = vadd.f32 %v2559_v17, %v304_v21 }
  0xef   :  { %v2016_v25 = vpop.f32.mrb[8].mxu0  ;;  %3282 = vst [vmem:[#allocation11_spill] sm:$0xff] %v2659_v9 }
  0xf0   :  { %v1990_v24 = vpop.f32.mrb[8].mxu1  ;;  %v760_v27 = vadd.f32 %v2016_v25, %v2562_v22  ;;  %v680_v29 = vpop.f32.mrb[9].mxu0  ;;  %3283 = vst [vmem:[#allocation12_spill] sm:$0xff] %v2662_v10 }
  0xf1   :  { %v2568_v26 = vadd.f32 %v1990_v24, %v2562_v22  ;;  %v454_v28 = vpop.f32.mrb[9].mxu1  ;;  %v759_v31 = vadd.f32 %v680_v29, %v2565_v23 }
  0xf2   :  { %v2572_v30 = vadd.f32 %v454_v28, %v2565_v23  ;;  %1245 = vrot.lane.b32.xlu0 %v760_v27, %s2097_s6  ;;  %v1593_v58 = vmul.f32 %v760_v27, %v760_v27 }
  0xf3   :  { %3273 = vst [vmem:[#allocation2_spill] sm:$0xff] %v2568_v26  ;;  %v2019_v35 = vpop.f32.mrb[10].mxu0  ;;  %v1577_v57 = vmul.f32 %v2568_v26, %v2568_v26  ;;  %v1592_v0 = vmul.f32 %v759_v31, %v759_v31  ;;  %v2665_v11 = vadd.f32 %v760_v27, %v2568_v26 }
  0xf4   :  { %3274 = vst [vmem:[#allocation3_spill] sm:$0xff] %v2572_v30  ;;  %v1993_v34 = vpop.f32.mrb[10].mxu1  ;;  %v762_v37 = vadd.f32 %v2019_v35, %v2576_v32  ;;  %v690_v39 = vpop.f32.mrb[11].mxu0  ;;  %v1576_v63 = vmul.f32 %v2572_v30, %v2572_v30  ;;  %v2671_v15 = vadd.f32 %v759_v31, %v2572_v30 }
  0xf5   :  { %v2583_v36 = vadd.f32 %v1993_v34, %v2576_v32  ;;  %v464_v38 = vpop.f32.mrb[11].mxu1  ;;  %v2590_v41 = vadd.f32 %v690_v39, %v2580_v33  ;;  %v2668_v14 = vadd.f32 %v1593_v58, %v1577_v57 }
  0xf6   :  { %v2587_v40 = vadd.f32 %v464_v38, %v2580_v33  ;;  %1249 = vrot.lane.b32.xlu1 %v762_v37, %s2097_s6  ;;  %1243 = vrot.lane.b32.xlu0 %v759_v31, %s2097_s6  ;;  %v2677_v19 = vadd.f32 %v1592_v0, %v1576_v63  ;;  %v1595_v27 = vmul.f32 %v762_v37, %v762_v37 }
  0xf7   :  { %3275 = vst [vmem:[#allocation4_spill] sm:$0xff] %v2583_v36  ;;  %v2022_v45 = vpop.f32.mrb[12].mxu0  ;;  %v1579_v20 = vmul.f32 %v2583_v36, %v2583_v36  ;;  %v2688_v25 = vadd.f32 %v762_v37, %v2583_v36  ;;  %v1594_v29 = vmul.f32 %v2590_v41, %v2590_v41 }
  0xf8   :  { %3276 = vst [vmem:[#allocation5_spill] sm:$0xff] %v2587_v40  ;;  %v1996_v44 = vpop.f32.mrb[12].mxu1  ;;  %v2604_v47 = vadd.f32 %v2022_v45, %v2593_v42  ;;  %v700_v49 = vpop.f32.mrb[13].mxu0  ;;  %v1578_v28 = vmul.f32 %v2587_v40, %v2587_v40  ;;  %v2721_v0 = vadd.f32 %v2590_v41, %v2587_v40 }
  0xf9   :  { %v2601_v46 = vadd.f32 %v1996_v44, %v2593_v42  ;;  %v474_v48 = vpop.f32.mrb[13].mxu1  ;;  %v2610_v51 = vadd.f32 %v700_v49, %v2598_v43  ;;  %v2717_v63 = vadd.f32 %v1595_v27, %v1579_v20 }
  0xfa   :  { %v2607_v50 = vadd.f32 %v474_v48, %v2598_v43  ;;  %1247 = vrot.lane.b32.xlu1 %v2590_v41, %s2097_s6  ;;  %v1597_v34 = vmul.f32 %v2604_v47, %v2604_v47 }
  0xfb   :  { %3277 = vst [vmem:[#allocation6_spill] sm:$0xff] %v2601_v46  ;;  %v2025_v56 = vpop.f32.mrb[14].mxu0  ;;  %1251 = vrot.lane.b32.xlu0 %v2610_v51, %s2097_s6  ;;  %v1581_v31 = vmul.f32 %v2601_v46, %v2601_v46  ;;  %v1596_v37 = vmul.f32 %v2610_v51, %v2610_v51 }
  0xfc   :  { %3278 = vst [vmem:[#allocation7_spill] sm:$0xff] %v2607_v50  ;;  %v1999_v55 = vpop.f32.mrb[14].mxu1  ;;  %v766_v60 = vadd.f32 %v2025_v56, %v2613_v52  ;;  %v710_v62 = vpop.f32.mrb[15].mxu0  ;;  %v1580_v35 = vmul.f32 %v2607_v50, %v2607_v50 }
  0xfd   :  { %v2628_v59 = vadd.f32 %v1999_v55, %v2613_v52  ;;  %v484_v61 = vpop.f32.mrb[15].mxu1  ;;  %v765_v2 = vadd.f32 %v710_v62, %v2621_v54 }
  0xfe   :  { %v2634_v1 = vadd.f32 %v484_v61, %v2621_v54  ;;  %1253 = vrot.lane.b32.xlu1 %v2604_v47, %s2097_s6  ;;  %v1599_v45 = vmul.f32 %v766_v60, %v766_v60  ;;  %v2736_v20 = vadd.f32 %v1596_v37, %v1580_v35 }
  0xff   :  { %3279 = vst [vmem:[#allocation8_spill] sm:$0xff] %v2628_v59  ;;  %v2028_v13 = vpop.f32.mrb[16].mxu0  ;;  %1255 = vrot.lane.b32.xlu0 %v765_v2, %s2097_s6  ;;  %v1583_v44 = vmul.f32 %v2628_v59, %v2628_v59  ;;  %v1598_v58 = vmul.f32 %v765_v2, %v765_v2  ;;  %v2739_v27 = vadd.f32 %v766_v60, %v2628_v59 }
 0x100   :  { %3280 = vst [vmem:[#allocation9_spill] sm:$0xff] %v2634_v1  ;;  %v2002_v12 = vpop.f32.mrb[16].mxu1  ;;  %v768_v6 = vadd.f32 %v2028_v13, %v2618_v53  ;;  %v720_v17 = vpop.f32.mrb[17].mxu0  ;;  %v1582_v57 = vmul.f32 %v2634_v1, %v2634_v1  ;;  %v2727_v13 = vadd.f32 %v2604_v47, %v2601_v46  ;;  %v2745_v47 = vadd.f32 %v765_v2, %v2634_v1 }
 0x101   :  { %v2674_v16 = vadd.f32 %v2002_v12, %v2618_v53  ;;  %v494_v18 = vpop.f32.mrb[17].mxu1  ;;  %v2685_v24 = vadd.f32 %v720_v17, %v2639_v3  ;;  %v2723_v12 = vadd.f32 %v1594_v29, %v1578_v28  ;;  %v2734_v17 = vadd.f32 %v2610_v51, %v2607_v50 }
 0x102   :  { %v2682_v21 = vadd.f32 %v494_v18, %v2639_v3  ;;  %1257 = vrot.lane.b32.xlu1 %v766_v60, %s2097_s6  ;;  %v2730_v18 = vadd.f32 %v1597_v34, %v1581_v31  ;;  %v2742_v29 = vadd.f32 %v1599_v45, %v1583_v44  ;;  %v2751_v37 = vadd.f32 %v1598_v58, %v1582_v57 }
 0x103   :  { %3284 = vst [vmem:[#allocation13_spill] sm:$0xff] %v2674_v16  ;;  %v2031_v39 = vpop.f32.mrb[18].mxu0  ;;  %1259 = vrot.lane.b32.xlu0 %v2685_v24, %s2097_s6  ;;  %v1585_v60 = vmul.f32 %v2674_v16, %v2674_v16  ;;  %v2760_v2 = vadd.f32 %v768_v6, %v2674_v16  ;;  %v1601_v44 = vmul.f32 %v768_v6, %v768_v6 }
 0x104   :  { %3285 = vst [vmem:[#allocation14_spill] sm:$0xff] %v2682_v21  ;;  %v2005_v38 = vpop.f32.mrb[18].mxu1  ;;  %v770_v49 = vadd.f32 %v2031_v39, %v2643_v5  ;;  %v730_v56 = vpop.f32.mrb[19].mxu0  ;;  %v1584_v45 = vmul.f32 %v2682_v21, %v2682_v21 }
 0x105   :  { %v2708_v48 = vadd.f32 %v2005_v38, %v2643_v5  ;;  %v504_v55 = vpop.f32.mrb[19].mxu1  ;;  %v769_v62 = vadd.f32 %v730_v56, %v2647_v7  ;;  %v2786_v30 = vadd.f32 %v1601_v44, %v1585_v60 }
 0x106   :  { %v2714_v61 = vadd.f32 %v504_v55, %v2647_v7  ;;  %1261 = vrot.lane.b32.xlu1 %v768_v6, %s2097_s6  ;;  %v1600_v55 = vmul.f32 %v2685_v24, %v2685_v24  ;;  %v1603_v57 = vmul.f32 %v770_v49, %v770_v49 }
 0x107   :  { %3286 = vst [vmem:[#allocation15_spill] sm:$0xff] %v2708_v48  ;;  %v2034_v28 = vpop.f32.mrb[20].mxu0  ;;  %1263 = vrot.lane.b32.xlu0 %v769_v62, %s2097_s6  ;;  %v1587_v56 = vmul.f32 %v2708_v48, %v2708_v48 }
 0x108   :  { %3287 = vst [vmem:[#allocation16_spill] sm:$0xff] %v2714_v61  ;;  %v2008_v41 = vpop.f32.mrb[20].mxu1  ;;  %v772_v51 = vadd.f32 %v2034_v28, %v2651_v4  ;;  %v740_v35 = vpop.f32.mrb[21].mxu0  ;;  %v1586_v58 = vmul.f32 %v2714_v61, %v2714_v61 }
 0x109   :  { %v2748_v31 = vadd.f32 %v2008_v41, %v2651_v4  ;;  %v514_v34 = vpop.f32.mrb[21].mxu1  ;;  %v771_v39 = vadd.f32 %v740_v35, %v2656_v8  ;;  %v1602_v41 = vmul.f32 %v769_v62, %v769_v62 }
 0x10a   :  { %v2756_v38 = vadd.f32 %v514_v34, %v2656_v8  ;;  %1265 = vrot.lane.b32.xlu1 %v770_v49, %s2097_s6  ;;  %v1605_v35 = vmul.f32 %v772_v51, %v772_v51  ;;  %v2792_v8 = vadd.f32 %v1600_v55, %v1584_v45 }
 0x10b   :  { %3288 = vst [vmem:[#allocation17_spill] sm:$0xff] %v2748_v31  ;;  %v2037_v34 = vpop.f32.mrb[22].mxu0  ;;  %1267 = vrot.lane.b32.xlu0 %v771_v39, %s2097_s6  ;;  %v1589_v6 = vmul.f32 %v2748_v31, %v2748_v31  ;;  %v1604_v36 = vmul.f32 %v771_v39, %v771_v39  ;;  %v2806_v60 = vadd.f32 %v772_v51, %v2748_v31 }
 0x10c   :  { %3289 = vst [vmem:[#allocation18_spill] sm:$0xff] %v2756_v38  ;;  %v2011_v28 = vpop.f32.mrb[22].mxu1  ;;  %v774_v59 = vadd.f32 %v2037_v34, %v2659_v9  ;;  %v750_v46 = vpop.f32.mrb[23].mxu0  ;;  %v1588_v50 = vmul.f32 %v2756_v38, %v2756_v38  ;;  %v2795_v34 = vadd.f32 %v770_v49, %v2708_v48  ;;  %v2813_v49 = vadd.f32 %v771_v39, %v2756_v38 }
 0x10d   :  { %v2775_v16 = vadd.f32 %v2011_v28, %v2659_v9  ;;  %v524_v1 = vpop.f32.mrb[23].mxu1  ;;  %v2784_v26 = vadd.f32 %v750_v46, %v2662_v10  ;;  %v2790_v28 = vadd.f32 %v2685_v24, %v2682_v21  ;;  %v2798_v9 = vadd.f32 %v1603_v57, %v1587_v56 }
 0x10e   :  { %v2781_v40 = vadd.f32 %v524_v1, %v2662_v10  ;;  %1269 = vrot.lane.b32.xlu1 %v772_v51, %s2097_s6  ;;  %v2801_v1 = vadd.f32 %v769_v62, %v2714_v61  ;;  %v2803_v46 = vadd.f32 %v1602_v41, %v1586_v58  ;;  %v2810_v45 = vadd.f32 %v1605_v35, %v1589_v6 }
 0x10f   :  { %3290 = vst [vmem:[#allocation19_spill] sm:$0xff] %v2775_v16  ;;  %3291 = vst [vmem:[#allocation20_spill] sm:$0xff] %v2784_v26  ;;  %v2068_v24 = vpop.f32.mrb[24].mxu0  ;;  %1271 = vrot.lane.b32.xlu0 %v2784_v26, %s2097_s6  ;;  %v2817_v58 = vadd.f32 %v1604_v36, %v1588_v50  ;;  %v2821_v51 = vmul.f32 %v2775_v16, %v2775_v16  ;;  %v2826_v35 = vadd.f32 %v774_v59, %v2775_v16 }
 0x110   :  { %v2042_v44 = vpop.f32.mrb[24].mxu1  ;;  %v1212_v62 = vadd.f32 %v2068_v24, %v2562_v22  ;;  %v1132_v57 = vpop.f32.mrb[25].mxu0 }
 0x111   :  { %v986_v55 = vadd.f32 %v2042_v44, %v2562_v22  ;;  %v906_v56 = vpop.f32.mrb[25].mxu1  ;;  %3292 = vst [vmem:[#allocation21_spill] sm:$0xff] %v2817_v58  ;;  %v1211_v6 = vadd.f32 %v1132_v57, %v2565_v23  ;;  %3293 = vst [vmem:[#allocation22_spill] sm:$0xff] %v2826_v35  ;;  %v2829_v22 = vmul.f32 %v774_v59, %v774_v59 }
 0x112   :  { %v985_v41 = vadd.f32 %v906_v56, %v2565_v23  ;;  %v1641_v44 = vmul.f32 %v1212_v62, %v1212_v62  ;;  %1273 = vrot.lane.b32.xlu1 %v774_v59, %s2097_s6 }
 0x113   :  { %v1625_v39 = vmul.f32 %v986_v55, %v986_v55  ;;  %v1504_v31 = vadd.f32 %v1212_v62, %v986_v55  ;;  %v1640_v24 = vmul.f32 %v1211_v6, %v1211_v6  ;;  %v2071_v48 = vpop.f32.mrb[26].mxu0 }
 0x114   :  { %v1624_v36 = vmul.f32 %v985_v41, %v985_v41  ;;  %v1503_v50 = vadd.f32 %v1211_v6, %v985_v41  ;;  %v2045_v38 = vpop.f32.mrb[26].mxu1  ;;  %1307 = vrot.lane.b32.xlu0 %v985_v41, %s2098_s23  ;;  %v2835_v16 = vadd.f32 %v2071_v48, %v2576_v32  ;;  %v1142_v21 = vpop.f32.mrb[27].mxu0 }
 0x115   :  { %v1520_v23 = vadd.f32 %v1504_v31, %v2665_v11  ;;  %v1657_v56 = vadd.f32 %v1641_v44, %v1625_v39  ;;  %v988_v57 = vadd.f32 %v2045_v38, %v2576_v32  ;;  %v916_v61 = vpop.f32.mrb[27].mxu1  ;;  %v1213_v58 = vadd.f32 %v1142_v21, %v2580_v33 }
 0x116   :  { %v1519_v59 = vadd.f32 %v1503_v50, %v2671_v15  ;;  %v1656_v26 = vadd.f32 %v1640_v24, %v1624_v36  ;;  %v987_v35 = vadd.f32 %v916_v61, %v2580_v33  ;;  %1309 = vrot.lane.b32.xlu1 %v986_v55, %s2098_s23  ;;  %v1643_v15 = vmul.f32 %v2835_v16, %v2835_v16 }
 0x117   :  { %v1536_v10 = vsel %vm115_vm1, %v1520_v23, 0.0  ;;  %v1673_v41 = vadd.f32 %v1657_v56, %v2668_v14  ;;  %v1627_v11 = vmul.f32 %v988_v57, %v988_v57  ;;  %v1506_v31 = vadd.f32 %v2835_v16, %v988_v57  ;;  %v2074_v39 = vpop.f32.mrb[28].mxu0 }
 0x118   :  { %v1535_v32 = vsel %vm115_vm1, %v1519_v59, 0.0  ;;  %v1672_v48 = vadd.f32 %v1656_v26, %v2677_v19  ;;  %v1626_v38 = vmul.f32 %v987_v35, %v987_v35  ;;  %v2048_v61 = vpop.f32.mrb[28].mxu1  ;;  %1371 = vrot.lane.b32.xlu0 %v1211_v6, %s2099_s5  ;;  %v1505_v44 = vadd.f32 %v1213_v58, %v987_v35  ;;  %v1152_v36 = vpop.f32.mrb[29].mxu0 }
 0x119   :  { %v1689_v33 = vsel %vm115_vm1, %v1673_v41, 0.0  ;;  %v1537_v14 = vadd.f32 %v1536_v10, %v1535_v32  ;;  %v1522_v21 = vadd.f32 %v1506_v31, %v2688_v25  ;;  %v926_v55 = vpop.f32.mrb[29].mxu1  ;;  %v1659_v26 = vadd.f32 %v1643_v15, %v1627_v11 }
 0x11a   :  { %v1688_v50 = vsel %vm115_vm1, %v1672_v48, 0.0  ;;  %v1642_v19 = vmul.f32 %v1213_v58, %v1213_v58  ;;  %v2853_v24 = vadd.f32 %v2048_v61, %v2593_v42  ;;  %v2857_v23 = vmul.f32 %v2781_v40, %v2781_v40  ;;  %1373 = vrot.lane.b32.xlu1 %v1212_v62, %s2099_s5 }
 0x11b   :  { %v1690_v6 = vadd.f32 %v1689_v33, %v1688_v50  ;;  %v1521_v56 = vadd.f32 %v1505_v44, %v2721_v0  ;;  %v2861_v10 = vadd.f32 %v2074_v39, %v2593_v42  ;;  %v1675_v25 = vadd.f32 %v1659_v26, %v2717_v63  ;;  %v2077_v32 = vpop.f32.mrb[30].mxu0 }
 0x11c   :  { %v1658_v59 = vadd.f32 %v1642_v19, %v1626_v38  ;;  %v1629_v41 = vmul.f32 %v2853_v24, %v2853_v24  ;;  %v989_v11 = vadd.f32 %v926_v55, %v2598_v43  ;;  %v2051_v31 = vpop.f32.mrb[30].mxu1  ;;  %1311 = vrot.lane.b32.xlu0 %v987_v35, %s2098_s23  ;;  %v1215_v63 = vadd.f32 %v1152_v36, %v2598_v43  ;;  %v1162_v15 = vpop.f32.mrb[31].mxu0 }
 0x11d   :  { %v1538_v48 = vsel %vm115_vm1, %v1521_v56, 0.0  ;;  %v1508_v42 = vadd.f32 %v2861_v10, %v2853_v24  ;;  %v1645_v0 = vmul.f32 %v2861_v10, %v2861_v10  ;;  %v936_v62 = vpop.f32.mrb[31].mxu1  ;;  %v1540_v38 = vsel %vm115_vm1, %v1522_v21, 0.0 }
 0x11e   :  { %v1539_v61 = vadd.f32 %v1538_v48, %v1537_v14  ;;  %v1674_v39 = vadd.f32 %v1658_v59, %v2723_v12  ;;  %v1628_v33 = vmul.f32 %v989_v11, %v989_v11  ;;  %v1507_v55 = vadd.f32 %v1215_v63, %v989_v11  ;;  %1313 = vrot.lane.b32.xlu1 %v988_v57, %s2098_s23 }
 0x11f   :  { %v1524_v35 = vadd.f32 %v1508_v42, %v2727_v13  ;;  %v1661_v44 = vadd.f32 %v1645_v0, %v1629_v41  ;;  %v1644_v50 = vmul.f32 %v1215_v63, %v1215_v63  ;;  %v2881_v43 = vadd.f32 %v2051_v31, %v2613_v52  ;;  %v2080_v21 = vpop.f32.mrb[32].mxu0 }
 0x120   :  { %v1691_v26 = vsel %vm115_vm1, %v1674_v39, 0.0  ;;  %v1541_v19 = vadd.f32 %v1540_v38, %v1539_v61  ;;  %v2884_v36 = vadd.f32 %v2077_v32, %v2613_v52  ;;  %v2054_v14 = vpop.f32.mrb[32].mxu1  ;;  %1375 = vrot.lane.b32.xlu0 %v1213_v58, %s2099_s5  ;;  %v1693_v12 = vsel %vm115_vm1, %v1675_v25, 0.0  ;;  %v1172_v41 = vpop.f32.mrb[33].mxu0 }
 0x121   :  { %v1692_v13 = vadd.f32 %v1691_v26, %v1690_v6  ;;  %v1677_v56 = vadd.f32 %v1661_v44, %v2730_v18  ;;  %v1523_v57 = vadd.f32 %v1507_v55, %v2734_v17  ;;  %v946_v59 = vpop.f32.mrb[33].mxu1  ;;  %v1660_v48 = vadd.f32 %v1644_v50, %v1628_v33 }
 0x122   :  { %v1631_v31 = vmul.f32 %v2881_v43, %v2881_v43  ;;  %v1510_v52 = vadd.f32 %v2884_v36, %v2881_v43  ;;  %v1647_v32 = vmul.f32 %v2884_v36, %v2884_v36  ;;  %v1544_v58 = vsel %vm115_vm1, %v1524_v35, 0.0  ;;  %1377 = vrot.lane.b32.xlu1 %v2835_v16, %s2099_s5 }
 0x123   :  { %v1542_v6 = vsel %vm115_vm1, %v1523_v57, 0.0  ;;  %v1694_v25 = vadd.f32 %v1693_v12, %v1692_v13  ;;  %v991_v18 = vadd.f32 %v936_v62, %v2621_v54  ;;  %v1676_v42 = vadd.f32 %v1660_v48, %v2736_v20  ;;  %v2083_v39 = vpop.f32.mrb[34].mxu0 }
 0x124   :  { %v1543_v17 = vadd.f32 %v1542_v6, %v1541_v19  ;;  %v1526_v0 = vadd.f32 %v1510_v52, %v2739_v27  ;;  %v1663_v38 = vadd.f32 %v1647_v32, %v1631_v31  ;;  %v2057_v61 = vpop.f32.mrb[34].mxu1  ;;  %1315 = vrot.lane.b32.xlu0 %v989_v11, %s2098_s23  ;;  %v1217_v35 = vadd.f32 %v1162_v15, %v2621_v54  ;;  %v1182_v55 = vpop.f32.mrb[35].mxu0 }
 0x125   :  { %v1630_v33 = vmul.f32 %v991_v18, %v991_v18  ;;  %v2906_v44 = vadd.f32 %v2054_v14, %v2618_v53  ;;  %v2909_v62 = vadd.f32 %v2080_v21, %v2618_v53  ;;  %v956_v16 = vpop.f32.mrb[35].mxu1  ;;  %v1697_v20 = vsel %vm115_vm1, %v1677_v56, 0.0 }
 0x126   :  { %v1695_v27 = vsel %vm115_vm1, %v1676_v42, 0.0  ;;  %v1679_v50 = vadd.f32 %v1663_v38, %v2742_v29  ;;  %v1545_v26 = vadd.f32 %v1544_v58, %v1543_v17  ;;  %v1509_v11 = vadd.f32 %v1217_v35, %v991_v18  ;;  %1317 = vrot.lane.b32.xlu1 %v2853_v24, %s2098_s23 }
 0x127   :  { %v1696_v19 = vadd.f32 %v1695_v27, %v1694_v25  ;;  %v1646_v12 = vmul.f32 %v1217_v35, %v1217_v35  ;;  %v1633_v54 = vmul.f32 %v2906_v44, %v2906_v44  ;;  %v1548_v53 = vsel %vm115_vm1, %v1526_v0, 0.0  ;;  %v2086_v13 = vpop.f32.mrb[36].mxu0 }
 0x128   :  { %v1512_v15 = vadd.f32 %v2909_v62, %v2906_v44  ;;  %v1649_v14 = vmul.f32 %v2909_v62, %v2909_v62  ;;  %v2924_v29 = vadd.f32 %v946_v59, %v2639_v3  ;;  %v2060_v21 = vpop.f32.mrb[36].mxu1  ;;  %1379 = vrot.lane.b32.xlu0 %v1215_v63, %s2099_s5  ;;  %v1525_v56 = vadd.f32 %v1509_v11, %v2745_v47  ;;  %v1192_v52 = vpop.f32.mrb[37].mxu0 }
 0x129   :  { %v1662_v57 = vadd.f32 %v1646_v12, %v1630_v33  ;;  %v1698_v48 = vadd.f32 %v1697_v20, %v1696_v19  ;;  %v2929_v24 = vadd.f32 %v1172_v41, %v2639_v3  ;;  %v966_v31 = vpop.f32.mrb[37].mxu1  ;;  %v2935_v6 = vadd.f32 %v2057_v61, %v2643_v5 }
 0x12a   :  { %v1528_v32 = vadd.f32 %v1512_v15, %v2760_v2  ;;  %v1665_v58 = vadd.f32 %v1649_v14, %v1633_v54  ;;  %v1632_v59 = vmul.f32 %v2924_v29, %v2924_v29  ;;  %v1546_v63 = vsel %vm115_vm1, %v1525_v56, 0.0  ;;  %1381 = vrot.lane.b32.xlu1 %v2861_v10, %s2099_s5 }
 0x12b   :  { %v1678_v47 = vadd.f32 %v1662_v57, %v2751_v37  ;;  %v1511_v25 = vadd.f32 %v2929_v24, %v2924_v29  ;;  %v1648_v3 = vmul.f32 %v2929_v24, %v2929_v24  ;;  %v1701_v2 = vsel %vm115_vm1, %v1679_v50, 0.0  ;;  %v2089_v38 = vpop.f32.mrb[38].mxu0 }
 0x12c   :  { %v1547_v41 = vadd.f32 %v1546_v63, %v1545_v26  ;;  %v1681_v17 = vadd.f32 %v1665_v58, %v2786_v30  ;;  %v1635_v42 = vmul.f32 %v2935_v6, %v2935_v6  ;;  %v2063_v0 = vpop.f32.mrb[38].mxu1  ;;  %1319 = vrot.lane.b32.xlu0 %v991_v18, %s2098_s23  ;;  %v2953_v20 = vadd.f32 %v2083_v39, %v2643_v5  ;;  %v2957_v27 = vpop.f32.mrb[39].mxu0 }
 0x12d   :  { %v1699_v37 = vsel %vm115_vm1, %v1678_v47, 0.0  ;;  %v1527_v61 = vadd.f32 %v1511_v25, %v2790_v28  ;;  %v1664_v33 = vadd.f32 %v1648_v3, %v1632_v59  ;;  %v2955_v10 = vpop.f32.mrb[39].mxu1  ;;  %v1552_v50 = vsel %vm115_vm1, %v1528_v32, 0.0  ;;  %v3294_v59 = vld [vmem:[#allocation10_spill] sm:$0xff] }
 0x12e   :  { %v1700_v30 = vadd.f32 %v1699_v37, %v1698_v48  ;;  %v1549_v26 = vadd.f32 %v1548_v53, %v1547_v41  ;;  %v2961_v19 = vadd.f32 %v956_v16, %v2647_v7  ;;  %v1514_v28 = vadd.f32 %v2953_v20, %v2935_v6  ;;  %1321 = vrot.lane.b32.xlu1 %v2881_v43, %s2098_s23 }
 0x12f   :  { %v1550_v18 = vsel %vm115_vm1, %v1527_v61, 0.0  ;;  %v1680_v11 = vadd.f32 %v1664_v33, %v2792_v8  ;;  %v1651_v5 = vmul.f32 %v2953_v20, %v2953_v20  ;;  %v2974_v16 = vadd.f32 %v1182_v55, %v2647_v7 }
 0x130   :  { %v1551_v39 = vadd.f32 %v1550_v18, %v1549_v26  ;;  %v1702_v12 = vadd.f32 %v1701_v2, %v1700_v30  ;;  %v1634_v54 = vmul.f32 %v2961_v19, %v2961_v19  ;;  %1383 = vrot.lane.b32.xlu0 %v1217_v35, %s2099_s5  ;;  %v1530_v53 = vadd.f32 %v1514_v28, %v2795_v34 }
 0x131   :  { %v1703_v8 = vsel %vm115_vm1, %v1680_v11, 0.0  ;;  %v1667_v15 = vadd.f32 %v1651_v5, %v1635_v42  ;;  %v2980_v14 = vadd.f32 %v2060_v21, %v2651_v4  ;;  %v1513_v43 = vadd.f32 %v2974_v16, %v2961_v19  ;;  %v3296_v11 = vld [vmem:[#allocation12_spill] sm:$0xff] }
 0x132   :  { %v1704_v56 = vadd.f32 %v1703_v8, %v1702_v12  ;;  %v1553_v57 = vadd.f32 %v1552_v50, %v1551_v39  ;;  %v1650_v48 = vmul.f32 %v2974_v16, %v2974_v16  ;;  %v1705_v7 = vsel %vm115_vm1, %v1681_v17, 0.0  ;;  %1385 = vrot.lane.b32.xlu1 %v2884_v36, %s2099_s5  ;;  %v3298_v39 = vld [vmem:[#allocation22_spill] sm:$0xff]  ;;  %v3299_v8 = vld [vmem:[#allocation20_spill] sm:$0xff] }
 0x133   :  { %v1683_v35 = vadd.f32 %v1667_v15, %v2798_v9  ;;  %v1637_v55 = vmul.f32 %v2980_v14, %v2980_v14  ;;  %v2991_v34 = vadd.f32 %v2086_v13, %v2651_v4  ;;  %v1529_v21 = vadd.f32 %v1513_v43, %v2801_v1 }
 0x134   :  { %v1666_v32 = vadd.f32 %v1650_v48, %v1634_v54  ;;  %v1706_v58 = vadd.f32 %v1705_v7, %v1704_v56  ;;  %v997_v63 = vadd.f32 %v966_v31, %v3294_v59  ;;  %1323 = vrot.lane.b32.xlu0 %v2924_v29, %s2098_s23  ;;  %v1556_v9 = vsel %vm115_vm1, %v1530_v53, 0.0  ;;  %v3295_v31 = vld [vmem:[#allocation11_spill] sm:$0xff] }
 0x135   :  { %v1516_v47 = vadd.f32 %v2991_v34, %v2980_v14  ;;  %v1653_v4 = vmul.f32 %v2991_v34, %v2991_v34  ;;  %v3005_v13 = vadd.f32 %v1192_v52, %v3294_v59  ;;  %v1554_v1 = vsel %vm115_vm1, %v1529_v21, 0.0 }
 0x136   :  { %v1682_v36 = vadd.f32 %v1666_v32, %v2803_v46  ;;  %v1636_v25 = vmul.f32 %v997_v63, %v997_v63  ;;  %v3010_v3 = vadd.f32 %v2063_v0, %v3295_v31  ;;  %v1555_v29 = vadd.f32 %v1554_v1, %v1553_v57  ;;  %1325 = vrot.lane.b32.xlu1 %v2906_v44, %s2098_s23 }
 0x137   :  { %v1532_v2 = vadd.f32 %v1516_v47, %v2806_v60  ;;  %v1669_v41 = vadd.f32 %v1653_v4, %v1637_v55  ;;  %v1515_v17 = vadd.f32 %v3005_v13, %v997_v63  ;;  %v1652_v42 = vmul.f32 %v3005_v13, %v3005_v13 }
 0x138   :  { %v1707_v52 = vsel %vm115_vm1, %v1682_v36, 0.0  ;;  %v1639_v46 = vmul.f32 %v3010_v3, %v3010_v3  ;;  %v3022_v0 = vadd.f32 %v2089_v38, %v3295_v31  ;;  %1387 = vrot.lane.b32.xlu0 %v2929_v24, %s2099_s5  ;;  %v1709_v60 = vsel %vm115_vm1, %v1683_v35, 0.0 }
 0x139   :  { %v1708_v37 = vadd.f32 %v1707_v52, %v1706_v58  ;;  %v1685_v61 = vadd.f32 %v1669_v41, %v2810_v45  ;;  %v1531_v44 = vadd.f32 %v1515_v17, %v2813_v49  ;;  %v1557_v33 = vadd.f32 %v1556_v9, %v1555_v29  ;;  %v3297_v49 = vld [vmem:[#allocation21_spill] sm:$0xff] }
 0x13a   :  { %v1668_v30 = vadd.f32 %v1652_v42, %v1636_v25  ;;  %v1518_v50 = vadd.f32 %v3022_v0, %v3010_v3  ;;  %v1655_v26 = vmul.f32 %v3022_v0, %v3022_v0  ;;  %v1623_v38 = vadd.f32 %v2829_v22, %v2821_v51  ;;  %1389 = vrot.lane.b32.xlu1 %v2909_v62, %s2099_s5 }
 0x13b   :  { %v1558_v24 = vsel %vm115_vm1, %v1531_v44, 0.0  ;;  %v1710_v18 = vadd.f32 %v1709_v60, %v1708_v37  ;;  %v999_v28 = vadd.f32 %v2955_v10, %v3296_v11  ;;  %v1606_v51 = vmul.f32 %v3299_v8, %v3299_v8 }
 0x13c   :  { %v1559_v45 = vadd.f32 %v1558_v24, %v1557_v33  ;;  %v1684_v5 = vadd.f32 %v1668_v30, %v3297_v49  ;;  %v1534_v12 = vadd.f32 %v1518_v50, %v3298_v39  ;;  %v1671_v54 = vadd.f32 %v1655_v26, %v1639_v46  ;;  %1327 = vrot.lane.b32.xlu0 %v2961_v19, %s2098_s23 }
 0x13d   :  { %v1560_v22 = vsel %vm115_vm1, %v1532_v2, 0.0  ;;  %v1638_v53 = vmul.f32 %v999_v28, %v999_v28  ;;  %v1225_v10 = vadd.f32 %v2957_v27, %v3296_v11  ;;  %v1501_v43 = vadd.f32 %v3299_v8, %v2781_v40 }
 0x13e   :  { %v1711_v62 = vsel %vm115_vm1, %v1684_v5, 0.0  ;;  %v1687_v15 = vadd.f32 %v1671_v54, %v1623_v38  ;;  %v1561_v56 = vadd.f32 %v1560_v22, %v1559_v45  ;;  %1329 = vrot.lane.b32.xlu1 %v2935_v6, %s2098_s23  ;;  %v1713_v19 = vsel %vm115_vm1, %v1685_v61, 0.0  ;;  %v3300_v5 = vld [vmem:[#allocation3_spill] sm:$0xff]  ;;  %v3301_v22 = vld [vmem:[#allocation2_spill] sm:$0xff] }
 0x13f   :  { %v1712_v57 = vadd.f32 %v1711_v62, %v1710_v18  ;;  %v1517_v48 = vadd.f32 %v1225_v10, %v999_v28  ;;  %v1654_v7 = vmul.f32 %v1225_v10, %v1225_v10  ;;  %v1622_v27 = vadd.f32 %v1606_v51, %v2857_v23 }
 0x140   :  { %1391 = vrot.lane.b32.xlu0 %v2974_v16, %s2099_s5  ;;  %v1564_v6 = vsel %vm115_vm1, %v1534_v12, 0.0  ;;  %v1717_v23 = vsel %vm115_vm1, %v1687_v15, 0.0 }
 0x141   :  { %v1533_v35 = vadd.f32 %v1517_v48, %v1501_v43  ;;  %v1670_v55 = vadd.f32 %v1654_v7, %v1638_v53  ;;  %v1714_v21 = vadd.f32 %v1713_v19, %v1712_v57  ;;  %v3302_v43 = vld [vmem:[#allocation5_spill] sm:$0xff] }
 0x142   :  { %1393 = vrot.lane.b32.xlu1 %v2953_v20, %s2099_s5 }
 0x143   :  { %v1562_v32 = vsel %vm115_vm1, %v1533_v35, 0.0  ;;  %v1686_v58 = vadd.f32 %v1670_v55, %v1622_v27  ;;  %v3303_v35 = vld [vmem:[#allocation4_spill] sm:$0xff] }
 0x144   :  { %v1563_v59 = vadd.f32 %v1562_v32, %v1561_v56  ;;  %1331 = vrot.lane.b32.xlu0 %v997_v63, %s2098_s23 }
 0x145   :  { %v1715_v9 = vsel %vm115_vm1, %v1686_v58, 0.0 }
 0x146   :  { %v1565_v47 = vadd.f32 %v1564_v6, %v1563_v59  ;;  %v1716_v16 = vadd.f32 %v1715_v9, %v1714_v21  ;;  %1333 = vrot.lane.b32.xlu1 %v2980_v14, %s2098_s23  ;;  %v3304_v6 = vld [vmem:[#allocation7_spill] sm:$0xff] }
 0x148   :  { %v1566_v4 = vrot.slane %v1565_v47, 4  ;;  %v1718_v1 = vadd.f32 %v1717_v23, %v1716_v16  ;;  %1395 = vrot.lane.b32.xlu0 %v3005_v13, %s2099_s5  ;;  %v1486_v13 = vld [vmem:[%s3246_s8] sm:$0x1] }
 0x14a   :  { %v1567_v20 = vadd.f32 %v1566_v4, %v1565_v47  ;;  %v1719_v36 = vrot.slane %v1718_v1, 4  ;;  %1397 = vrot.lane.b32.xlu1 %v2991_v34, %s2099_s5  ;;  %v1575_v34 = vld [vmem:[%s3247_s9] sm:$0x1] }
 0x14c   :  { %v1568_v63 = vrot.slane %v1567_v20, 2  ;;  %v1720_v25 = vadd.f32 %v1719_v36, %v1718_v1  ;;  %1335 = vrot.lane.b32.xlu0 %v999_v28, %s2098_s23  ;;  %v3305_v1 = vld [vmem:[#allocation6_spill] sm:$0xff] }
 0x14e   :  { %v1569_v31 = vadd.f32 %v1568_v63, %v1567_v20  ;;  %v1721_v29 = vrot.slane %v1720_v25, 2  ;;  %1337 = vrot.lane.b32.xlu1 %v3010_v3, %s2098_s23 }
 0x150   :  { %v1570_v14 = vrot.slane %v1569_v31, 1  ;;  %v1722_v2 = vadd.f32 %v1721_v29, %v1720_v25  ;;  %1399 = vrot.lane.b32.xlu0 %v1225_v10, %s2099_s5  ;;  %v3306_v29 = vld [vmem:[#allocation9_spill] sm:$0xff] }
 0x152   :  { %v1571_v41 = vadd.f32 %v1570_v14, %v1569_v31  ;;  %v1723_v17 = vrot.slane %v1722_v2, 1  ;;  %1401 = vrot.lane.b32.xlu1 %v3022_v0, %s2099_s5 }
 0x154   :  { %v1572_v52 = vadd.f32 %v1571_v41, %v1486_v13  ;;  %v1724_v42 = vadd.f32 %v1723_v17, %v1722_v2 }
 0x156   :  { %1574 = vst.msk [vmem:[%s3246_s8] sm:$0x1] %vm317_vm2, %v1572_v52  ;;  %v1725_v3 = vadd.f32 %v1724_v42, %v1575_v34  ;;  %v3307_v34 = vld [vmem:[#allocation8_spill] sm:$0xff] }
 0x158   :  { %1726 = vst.msk [vmem:[%s3247_s9] sm:$0x1] %vm317_vm2, %v1725_v3 }
 0x164   :  { %v1246_v46 = vpop.permute.xlu0 %1245 }
 0x165   :  { %v1420_v53 = vsel %vm115_vm1, %v3301_v22, %v1246_v46 }
 0x168   :  { %v1250_v60 = vpop.permute.xlu1 %1249  ;;  %v1244_v37 = vpop.permute.xlu0 %1243 }
 0x169   :  { %v1419_v39 = vsel %vm115_vm1, %v3300_v5, %v1244_v37  ;;  %v1422_v55 = vsel %vm115_vm1, %v3303_v35, %v1250_v60  ;;  %v3308_v37 = vld [vmem:[#allocation14_spill] sm:$0xff] }
 0x16c   :  { %v1248_v61 = vpop.permute.xlu1 %1247 }
 0x16d   :  { %v1252_v44 = vpop.permute.xlu0 %1251  ;;  %v1421_v57 = vsel %vm115_vm1, %v3302_v43, %v1248_v61 }
 0x16e   :  { %v1423_v9 = vsel %vm115_vm1, %v3304_v6, %v1252_v44 }
 0x170   :  { %v1254_v33 = vpop.permute.xlu1 %1253 }
 0x171   :  { %v1256_v0 = vpop.permute.xlu0 %1255  ;;  %v1424_v20 = vsel %vm115_vm1, %v3305_v1, %v1254_v33 }
 0x172   :  { %v1425_v14 = vsel %vm115_vm1, %v3306_v29, %v1256_v0 }
 0x174   :  { %v1258_v30 = vpop.permute.xlu1 %1257 }
 0x175   :  { %v1260_v50 = vpop.permute.xlu0 %1259  ;;  %v1426_v52 = vsel %vm115_vm1, %v3307_v34, %v1258_v30 }
 0x176   :  { %v1427_v61 = vsel %vm115_vm1, %v3308_v37, %v1260_v50 }
 0x178   :  { %v3091_v26 = vpop.permute.xlu1 %1261 }
 0x179   :  { %v3093_v38 = vpop.permute.xlu0 %1263 }
 0x17c   :  { %v3095_v24 = vpop.permute.xlu1 %1265 }
 0x17d   :  { %v3097_v18 = vpop.permute.xlu0 %1267 }
 0x180   :  { %v3099_v11 = vpop.permute.xlu1 %1269 }
 0x181   :  { %v3101_v28 = vpop.permute.xlu0 %1271 }
 0x184   :  { %v3103_v45 = vpop.permute.xlu1 %1273 }
 0x186   :  { %v1308_v49 = vpop.permute.xlu0 %1307 }
 0x187   :  { %v1436_v54 = vsel %vm1435_vm3, %v1419_v39, %v1308_v49  ;;  %v3309_v49 = vld [vmem:[#allocation13_spill] sm:$0xff] }
 0x188   :  { %v1310_v12 = vpop.permute.xlu1 %1309  ;;  %v1428_v5 = vsel %vm115_vm1, %v3309_v49, %v3091_v26 }
 0x189   :  { %v1437_v10 = vsel %vm1435_vm3, %v1420_v53, %v1310_v12 }
 0x18a   :  { %v1372_v8 = vpop.permute.xlu0 %1371 }
 0x18b   :  { %v1453_v51 = vsel %vm1452_vm4, %v1436_v54, %v1372_v8  ;;  %v3310_v8 = vld [vmem:[#allocation16_spill] sm:$0xff] }
 0x18c   :  { %1470 = vst.msk [vmem:[%s3249_s7] sm:$0xff] %vm1469_vm5, %v1453_v51  ;;  %v1374_v62 = vpop.permute.xlu1 %1373  ;;  %v1429_v26 = vsel %vm115_vm1, %v3310_v8, %v3093_v38 }
 0x18d   :  { %v1454_v15 = vsel %vm1452_vm4, %v1437_v10, %v1374_v62  ;;  %v3311_v62 = vld [vmem:[#allocation15_spill] sm:$0xff] }
 0x18e   :  { %v1312_v56 = vpop.permute.xlu0 %1311  ;;  %1471 = vst.msk [vmem:[%s3249_s7 + $0x8] sm:$0xff] %vm1469_vm5, %v1454_v15  ;;  %v1430_v15 = vsel %vm115_vm1, %v3311_v62, %v3095_v24 }
 0x18f   :  { %v1438_v7 = vsel %vm1435_vm3, %v1421_v57, %v1312_v56 }
 0x190   :  { %v1314_v48 = vpop.permute.xlu1 %1313 }
 0x191   :  { %v1439_v21 = vsel %vm1435_vm3, %v1422_v55, %v1314_v48  ;;  %v3312_v48 = vld [vmem:[#allocation18_spill] sm:$0xff]  ;;  %v3313_v55 = vld [vmem:[#allocation17_spill] sm:$0xff] }
 0x192   :  { %v1376_v19 = vpop.permute.xlu0 %1375  ;;  %v1431_v24 = vsel %vm115_vm1, %v3312_v48, %v3097_v18 }
 0x193   :  { %v1455_v27 = vsel %vm1452_vm4, %v1438_v7, %v1376_v19 }
 0x194   :  { %1472 = vst.msk [vmem:[%s3249_s7 + $0x10] sm:$0xff] %vm1469_vm5, %v1455_v27  ;;  %v1378_v32 = vpop.permute.xlu1 %1377 }
 0x195   :  { %v1456_v58 = vsel %vm1452_vm4, %v1439_v21, %v1378_v32  ;;  %v1432_v21 = vsel %vm115_vm1, %v3313_v55, %v3099_v11  ;;  %v1433_v11 = vsel %vm115_vm1, %v2781_v40, %v3101_v28 }
 0x196   :  { %v1316_v59 = vpop.permute.xlu0 %1315  ;;  %1473 = vst.msk [vmem:[%s3249_s7 + $0x18] sm:$0xff] %vm1469_vm5, %v1456_v58 }
 0x197   :  { %v1440_v16 = vsel %vm1435_vm3, %v1423_v9, %v1316_v59 }
 0x198   :  { %v1318_v47 = vpop.permute.xlu1 %1317 }
 0x199   :  { %v1441_v36 = vsel %vm1435_vm3, %v1424_v20, %v1318_v47 }
 0x19a   :  { %v1380_v23 = vpop.permute.xlu0 %1379 }
 0x19b   :  { %v1457_v4 = vsel %vm1452_vm4, %v1440_v16, %v1380_v23  ;;  %v3314_v23 = vld [vmem:[#allocation19_spill] sm:$0xff] }
 0x19c   :  { %1474 = vst.msk [vmem:[%s3249_s7 + $0x20] sm:$0xff] %vm1469_vm5, %v1457_v4  ;;  %v1382_v63 = vpop.permute.xlu1 %1381  ;;  %v1434_v4 = vsel %vm115_vm1, %v3314_v23, %v3103_v45 }
 0x19d   :  { %v1458_v25 = vsel %vm1452_vm4, %v1441_v36, %v1382_v63 }
 0x19e   :  { %v1320_v31 = vpop.permute.xlu0 %1319  ;;  %1475 = vst.msk [vmem:[%s3249_s7 + $0x28] sm:$0xff] %vm1469_vm5, %v1458_v25 }
 0x19f   :  { %v1442_v13 = vsel %vm1435_vm3, %v1425_v14, %v1320_v31 }
 0x1a0   :  { %v1322_v2 = vpop.permute.xlu1 %1321 }
 0x1a1   :  { %v1443_v42 = vsel %vm1435_vm3, %v1426_v52, %v1322_v2 }
 0x1a2   :  { %v1384_v41 = vpop.permute.xlu0 %1383 }
 0x1a3   :  { %v1459_v17 = vsel %vm1452_vm4, %v1442_v13, %v1384_v41 }
 0x1a4   :  { %1476 = vst.msk [vmem:[%s3249_s7 + $0x30] sm:$0xff] %vm1469_vm5, %v1459_v17  ;;  %v1386_v3 = vpop.permute.xlu1 %1385 }
 0x1a5   :  { %v1460_v46 = vsel %vm1452_vm4, %v1443_v42, %v1386_v3 }
 0x1a6   :  { %v1324_v60 = vpop.permute.xlu0 %1323  ;;  %1477 = vst.msk [vmem:[%s3249_s7 + $0x38] sm:$0xff] %vm1469_vm5, %v1460_v46 }
 0x1a7   :  { %v1444_v33 = vsel %vm1435_vm3, %v1427_v61, %v1324_v60 }
 0x1a8   :  { %v1326_v44 = vpop.permute.xlu1 %1325 }
 0x1a9   :  { %v1445_v39 = vsel %vm1435_vm3, %v1428_v5, %v1326_v44 }
 0x1aa   :  { %v1388_v0 = vpop.permute.xlu0 %1387 }
 0x1ab   :  { %v1461_v30 = vsel %vm1452_vm4, %v1444_v33, %v1388_v0 }
 0x1ac   :  { %1478 = vst.msk [vmem:[%s3249_s7 + $0x40] sm:$0xff] %vm1469_vm5, %v1461_v30  ;;  %v1390_v12 = vpop.permute.xlu1 %1389 }
 0x1ad   :  { %v1462_v50 = vsel %vm1452_vm4, %v1445_v39, %v1390_v12 }
 0x1ae   :  { %v1328_v54 = vpop.permute.xlu0 %1327  ;;  %1479 = vst.msk [vmem:[%s3249_s7 + $0x48] sm:$0xff] %vm1469_vm5, %v1462_v50 }
 0x1af   :  { %v1446_v22 = vsel %vm1435_vm3, %v1429_v26, %v1328_v54 }
 0x1b0   :  { %v1330_v51 = vpop.permute.xlu1 %1329 }
 0x1b1   :  { %v1447_v56 = vsel %vm1435_vm3, %v1430_v15, %v1330_v51 }
 0x1b2   :  { %v1392_v53 = vpop.permute.xlu0 %1391 }
 0x1b3   :  { %v1463_v10 = vsel %vm1452_vm4, %v1446_v22, %v1392_v53 }
 0x1b4   :  { %1480 = vst.msk [vmem:[%s3249_s7 + $0x50] sm:$0xff] %vm1469_vm5, %v1463_v10  ;;  %v1394_v43 = vpop.permute.xlu1 %1393 }
 0x1b5   :  { %v1464_v38 = vsel %vm1452_vm4, %v1447_v56, %v1394_v43 }
 0x1b6   :  { %v1332_v57 = vpop.permute.xlu0 %1331  ;;  %1481 = vst.msk [vmem:[%s3249_s7 + $0x58] sm:$0xff] %vm1469_vm5, %v1464_v38 }
 0x1b7   :  { %v1448_v19 = vsel %vm1435_vm3, %v1431_v24, %v1332_v57 }
 0x1b8   :  { %v1334_v7 = vpop.permute.xlu1 %1333 }
 0x1b9   :  { %v1449_v32 = vsel %vm1435_vm3, %v1432_v21, %v1334_v7 }
 0x1ba   :  { %v1396_v27 = vpop.permute.xlu0 %1395 }
 0x1bb   :  { %v1465_v35 = vsel %vm1452_vm4, %v1448_v19, %v1396_v27 }
 0x1bc   :  { %1482 = vst.msk [vmem:[%s3249_s7 + $0x60] sm:$0xff] %vm1469_vm5, %v1465_v35  ;;  %v1398_v58 = vpop.permute.xlu1 %1397 }
 0x1bd   :  { %v1466_v18 = vsel %vm1452_vm4, %v1449_v32, %v1398_v58 }
 0x1be   :  { %v1336_v59 = vpop.permute.xlu0 %1335  ;;  %1483 = vst.msk [vmem:[%s3249_s7 + $0x68] sm:$0xff] %vm1469_vm5, %v1466_v18 }
 0x1bf   :  { %v1450_v9 = vsel %vm1435_vm3, %v1433_v11, %v1336_v59 }
 0x1c0   :  { %v1338_v6 = vpop.permute.xlu1 %1337 }
 0x1c1   :  { %v1451_v1 = vsel %vm1435_vm3, %v1434_v4, %v1338_v6 }
 0x1c2   :  { %v1400_v47 = vpop.permute.xlu0 %1399 }
 0x1c3   :  { %v1467_v16 = vsel %vm1452_vm4, %v1450_v9, %v1400_v47 }
 0x1c4   :  { %1484 = vst.msk [vmem:[%s3249_s7 + $0x70] sm:$0xff] %vm1469_vm5, %v1467_v16  ;;  %v1402_v20 = vpop.permute.xlu1 %1401 }
 0x1c5   :  { %v1468_v40 = vsel %vm1452_vm4, %v1451_v1, %v1402_v20 }
 0x1c6   :  { %1485 = vst.msk [vmem:[%s3249_s7 + $0x78] sm:$0xff] %vm1469_vm5, %v1468_v40 }

</bundles_post_ra>
